<compile_context>
chip_gen: v5e
topology: v5e:2x2
jax: 0.10.0
libtpu: 0.0.40
codegen_flags: <defaults>
</compile_context>

<pallas_src>
import functools

import jax
import jax.numpy as jnp
from jax.experimental import pallas as pl
from jax.experimental.pallas import tpu as pltpu

LANE = 128


def _round_up(n, m):
    return ((n + m - 1) // m) * m


def _make_cnn_kernel(filter_sizes, seq_len, vocab_size, e_pad, f_pad, h_pad,
                     o_pad, compute_dtype):
    nfs = len(filter_sizes)

    def kernel(ids_ref, table_ref, *refs):
        # refs layout:
        #   [0:nfs)   conv weights, each [fs * E_pad, F_pad]   (im2col layout)
        #   nfs       conv biases   [nfs, F_pad]               (f32)
        #   then fc1_w [nfs * F_pad, H_pad], fc1_b [1, H_pad],
        #        fc2_w [H_pad, O_pad],       fc2_b [1, O_pad]
        #   last ref is the output [TB, O_pad]
        conv_w_refs = refs[0:nfs]
        conv_b_ref = refs[nfs]
        fc1_w_ref, fc1_b_ref, fc2_w_ref, fc2_b_ref, out_ref = refs[nfs + 1:]

        tb = ids_ref.shape[0]

        # ---- fused embedding gather -------------------------------------
        # One-hot matmul against the (padded) table in VMEM: exact row copy,
        # runs on the MXU, avoids a data-dependent gather lowering.
        # TODO(synk): for large vocabularies this should become a scalar-
        # prefetch / make_async_copy row gather instead of a one-hot matmul.
        ids = ids_ref[...]                                         # [TB, S] i32
        iota = jax.lax.broadcasted_iota(
            jnp.int32, (tb, seq_len, vocab_size), 2)
        onehot = (ids[:, :, None] == iota).astype(jnp.float32)
        onehot = onehot.reshape(tb * seq_len, vocab_size).astype(compute_dtype)
        emb = jnp.dot(onehot, table_ref[...],
                      preferred_element_type=jnp.float32)          # [TB*S, E_pad]
        emb = emb.reshape(tb, seq_len, e_pad)                      # f32

        # ---- convs as im2col matmuls ------------------------------------
        h = jnp.zeros((tb, h_pad), jnp.float32)
        for i, fs in enumerate(filter_sizes):
            valid_len = seq_len - fs + 1
            # Build the im2col slab once (pieces are E_pad=128-lane aligned,
            # so the concat is a vreg-granular placement, no cross-lane mix).
            slab = jnp.concatenate(
                [emb[:, j:j + valid_len, :] for j in range(fs)], axis=-1)
            slab = slab.reshape(tb * valid_len, fs * e_pad)
            acc = jnp.dot(slab.astype(compute_dtype), conv_w_refs[i][...],
                          preferred_element_type=jnp.float32)      # [TB*L, F_pad]
            acc = acc.reshape(tb, valid_len, f_pad)
            # max-over-time first, then bias + ReLU on the [TB, F_pad] result
            # (valid: bias is constant over time, ReLU is monotonic).
            pooled = jnp.max(acc, axis=1) + conv_b_ref[i:i + 1, :]
            pooled = jnp.maximum(pooled, 0.0)                      # [TB, F_pad] f32
            # fc1 contribution of this filter-size block -- no lane concat.
            w1 = fc1_w_ref[i * f_pad:(i + 1) * f_pad, :]           # [F_pad, H_pad]
            h = h + jnp.dot(pooled.astype(compute_dtype), w1,
                            preferred_element_type=jnp.float32)

        # Dropout: eval-mode identity.  fc1 has no activation in the module.
        h = h + fc1_b_ref[...]
        out = jnp.dot(h.astype(compute_dtype), fc2_w_ref[...],
                      preferred_element_type=jnp.float32) + fc2_b_ref[...]
        out_ref[...] = out.astype(out_ref.dtype)

    return kernel


def init_params(key, vocab_size, embedding_dim, n_filters, filter_sizes,
                output_dim):
    """Deterministic synthetic parameters in the module's logical shapes."""
    keys = jax.random.split(key, 4 + 2 * len(filter_sizes))
    params = {}
    params["embedding"] = (
        jax.random.normal(keys[0], (vocab_size, embedding_dim), jnp.float32) * 0.1
    )
    for i, fs in enumerate(filter_sizes):
        # torch Conv2d weight is [F, 1, fs, E]; stored here as [fs, E, F].
        params[f"conv{i}_w"] = (
            jax.random.normal(keys[1 + 2 * i], (fs, embedding_dim, n_filters),
                              jnp.float32) * 0.1
        )
        params[f"conv{i}_b"] = (
            jax.random.normal(keys[2 + 2 * i], (1, n_filters), jnp.float32) * 0.1
        )
    k_off = 1 + 2 * len(filter_sizes)
    cat_dim = len(filter_sizes) * n_filters
    # torch Linear weight is [out, in]; stored here transposed as [in, out].
    params["fc1_w"] = (
        jax.random.normal(keys[k_off], (cat_dim, n_filters), jnp.float32) * 0.1
    )
    params["fc1_b"] = jnp.zeros((1, n_filters), jnp.float32)
    params["fc2_w"] = (
        jax.random.normal(keys[k_off + 1], (n_filters, output_dim), jnp.float32)
        * 0.1
    )
    params["fc2_b"] = jnp.zeros((1, output_dim), jnp.float32)
    return params


def pack_params(params, *, filter_sizes, n_filters, embedding_dim, output_dim,
                compute_dtype=jnp.bfloat16):
    """Pad weights to 128-lane boundaries and reshape into kernel layout."""
    nfs = len(filter_sizes)
    e_pad = _round_up(embedding_dim, LANE)
    f_pad = _round_up(n_filters, LANE)
    h_pad = _round_up(n_filters, LANE)
    o_pad = _round_up(output_dim, LANE)

    packed = {}
    packed["table"] = jnp.pad(
        params["embedding"], ((0, 0), (0, e_pad - embedding_dim))
    ).astype(compute_dtype)

    for i, fs in enumerate(filter_sizes):
        w = params[f"conv{i}_w"]  # [fs, E, F]
        w = jnp.pad(w, ((0, 0), (0, e_pad - embedding_dim),
                        (0, f_pad - n_filters)))
        packed[f"conv{i}_w"] = w.reshape(fs * e_pad, f_pad).astype(compute_dtype)

    cb = jnp.stack([params[f"conv{i}_b"].reshape(n_filters)
                    for i in range(nfs)])                      # [nfs, F]
    packed["conv_b"] = jnp.pad(
        cb, ((0, 0), (0, f_pad - n_filters))).astype(jnp.float32)

    fc1 = params["fc1_w"].reshape(nfs, n_filters, n_filters)   # [nfs, F, H]
    fc1 = jnp.pad(fc1, ((0, 0), (0, f_pad - n_filters),
                        (0, h_pad - n_filters)))
    packed["fc1_w"] = fc1.reshape(nfs * f_pad, h_pad).astype(compute_dtype)
    packed["fc1_b"] = jnp.pad(
        params["fc1_b"], ((0, 0), (0, h_pad - n_filters))).astype(jnp.float32)

    packed["fc2_w"] = jnp.pad(
        params["fc2_w"], ((0, h_pad - n_filters), (0, o_pad - output_dim))
    ).astype(compute_dtype)
    packed["fc2_b"] = jnp.pad(
        params["fc2_b"], ((0, 0), (0, o_pad - output_dim))).astype(jnp.float32)
    return packed


def cnn_forward(text, packed, *, filter_sizes, output_dim, batch_tile=128):
    """Embedding + convs + FCs in one batch-gridded pallas_call."""
    filter_sizes = tuple(filter_sizes)
    nfs = len(filter_sizes)
    batch, seq_len = text.shape
    if seq_len < max(filter_sizes):
        raise ValueError("seq_len must be >= max(filter_sizes)")

    vocab_size, e_pad = packed["table"].shape
    f_pad = packed["conv_b"].shape[1]
    h_pad = packed["fc1_b"].shape[1]
    o_pad = packed["fc2_b"].shape[1]
    compute_dtype = packed["table"].dtype

    # Batch tiling: whole batch in one tile if small, otherwise 128-row tiles
    # (batch padded so every block is full; pad rows use valid token id 0).
    if batch <= batch_tile:
        tb, b_pad = batch, batch
    else:
        tb = batch_tile
        b_pad = _round_up(batch, tb)
    if b_pad != batch:
        text = jnp.pad(text, ((0, b_pad - batch), (0, 0)))

    kernel = _make_cnn_kernel(filter_sizes, seq_len, vocab_size, e_pad,
                              f_pad, h_pad, o_pad, compute_dtype)

    kernel_inputs = [text, packed["table"]]
    kernel_inputs += [packed[f"conv{i}_w"] for i in range(nfs)]
    kernel_inputs += [packed["conv_b"], packed["fc1_w"], packed["fc1_b"],
                      packed["fc2_w"], packed["fc2_b"]]

    def _full(shape):
        return pl.BlockSpec(shape, lambda b: (0,) * len(shape))

    in_specs = [pl.BlockSpec((tb, seq_len), lambda b: (b, 0)),   # token ids
                _full((vocab_size, e_pad))]                      # table
    in_specs += [_full((fs * e_pad, f_pad)) for fs in filter_sizes]
    in_specs += [_full((nfs, f_pad)),              # conv biases
                 _full((nfs * f_pad, h_pad)),      # fc1_w (block layout)
                 _full((1, h_pad)),                # fc1_b
                 _full((h_pad, o_pad)),            # fc2_w
                 _full((1, o_pad))]                # fc2_b
    out_specs = pl.BlockSpec((tb, o_pad), lambda b: (b, 0))

    # Advisory cost estimate so XLA schedules the custom call sensibly.
    flops = 2 * b_pad * seq_len * vocab_size * e_pad
    for fs in filter_sizes:
        flops += 2 * b_pad * (seq_len - fs + 1) * fs * e_pad * f_pad
    flops += 2 * b_pad * nfs * f_pad * h_pad + 2 * b_pad * h_pad * o_pad
    param_bytes = sum(int(v.size) * v.dtype.itemsize for v in packed.values())
    bytes_accessed = int(b_pad * seq_len * 4 + param_bytes + b_pad * o_pad * 4)

    out = pl.pallas_call(
        kernel,
        out_shape=jax.ShapeDtypeStruct((b_pad, o_pad), jnp.float32),
        grid=(b_pad // tb,),
        in_specs=in_specs,
        out_specs=out_specs,
        compiler_params=pltpu.CompilerParams(
            dimension_semantics=("parallel",),
            vmem_limit_bytes=32 * 1024 * 1024),
        cost_estimate=pl.CostEstimate(flops=int(flops), transcendentals=0,
                                      bytes_accessed=bytes_accessed),
    )(*kernel_inputs)
    return out[:batch, :output_dim]


if __name__ == "__main__":
    # Small, module-consistent shapes.
    vocab_size = 50
    embedding_dim = 32
    n_filters = 16
    filter_sizes = (2, 3, 4)
    output_dim = 4
    batch = 2
    seq_len = 12

    key = jax.random.PRNGKey(0)
    k_tok, k_param = jax.random.split(key)

    text = jax.random.randint(k_tok, (batch, seq_len), 0, vocab_size,
                              dtype=jnp.int32)
    params = init_params(k_param, vocab_size, embedding_dim, n_filters,
                         filter_sizes, output_dim)
    packed = pack_params(params, filter_sizes=filter_sizes,
                         n_filters=n_filters, embedding_dim=embedding_dim,
                         output_dim=output_dim, compute_dtype=jnp.bfloat16)

    fwd = jax.jit(functools.partial(cnn_forward, filter_sizes=filter_sizes,
                                    output_dim=output_dim))
    out = fwd(text, packed)
    jax.block_until_ready(out)
    assert out.shape == (batch, output_dim)
    print("KERNEL_OK")
</pallas_src>

<mosaic_0001>
module attributes {stable_mosaic.version = 11 : i64} {
  func.func @kernel(%arg0: i32, %arg1: memref<2x12xi32, #tpu.memory_space<vmem>>, %arg2: memref<50x128xbf16, #tpu.memory_space<vmem>>, %arg3: memref<256x128xbf16, #tpu.memory_space<vmem>>, %arg4: memref<384x128xbf16, #tpu.memory_space<vmem>>, %arg5: memref<512x128xbf16, #tpu.memory_space<vmem>>, %arg6: memref<3x128xf32, #tpu.memory_space<vmem>>, %arg7: memref<384x128xbf16, #tpu.memory_space<vmem>>, %arg8: memref<1x128xf32, #tpu.memory_space<vmem>>, %arg9: memref<128x128xbf16, #tpu.memory_space<vmem>>, %arg10: memref<1x128xf32, #tpu.memory_space<vmem>>, %arg11: memref<2x128xf32, #tpu.memory_space<vmem>>) attributes {dimension_semantics = [#tpu.dimension_semantics<parallel>], iteration_bounds = array<i64: 1>, scalar_prefetch = 0 : i64, scratch_operands = 0 : i64, tpu.core_type = #tpu.core_type<tc>, window_params = [{transform_indices = @transform_0, window_bounds = array<i64: 2, 12>}, {pipeline_mode = #tpu.pipeline_mode<synchronous>, transform_indices = @transform_1, window_bounds = array<i64: 50, 128>}, {pipeline_mode = #tpu.pipeline_mode<synchronous>, transform_indices = @transform_2, window_bounds = array<i64: 256, 128>}, {pipeline_mode = #tpu.pipeline_mode<synchronous>, transform_indices = @transform_3, window_bounds = array<i64: 384, 128>}, {pipeline_mode = #tpu.pipeline_mode<synchronous>, transform_indices = @transform_4, window_bounds = array<i64: 512, 128>}, {pipeline_mode = #tpu.pipeline_mode<synchronous>, transform_indices = @transform_5, window_bounds = array<i64: 3, 128>}, {pipeline_mode = #tpu.pipeline_mode<synchronous>, transform_indices = @transform_6, window_bounds = array<i64: 384, 128>}, {pipeline_mode = #tpu.pipeline_mode<synchronous>, transform_indices = @transform_7, window_bounds = array<i64: 1, 128>}, {pipeline_mode = #tpu.pipeline_mode<synchronous>, transform_indices = @transform_8, window_bounds = array<i64: 128, 128>}, {pipeline_mode = #tpu.pipeline_mode<synchronous>, transform_indices = @transform_9, window_bounds = array<i64: 1, 128>}, {transform_indices = @transform_10, window_bounds = array<i64: 2, 128>}]} {
    %c0 = arith.constant 0 : index
    %c0_0 = arith.constant 0 : index
    %0 = vector.load %arg1[%c0, %c0_0] : memref<2x12xi32, #tpu.memory_space<vmem>>, vector<2x12xi32>
    %1 = tpu.iota {dimensions = array<i32: 2>} : vector<2x12x50xi32>
    %2 = vector.shape_cast %0 : vector<2x12xi32> to vector<2x12x1xi32>
    %3 = vector.broadcast %2 : vector<2x12x1xi32> to vector<2x12x50xi32>
    %4 = arith.cmpi eq, %3, %1 : vector<2x12x50xi32>
    %5 = arith.extui %4 : vector<2x12x50xi1> to vector<2x12x50xi32>
    %6 = arith.sitofp %5 : vector<2x12x50xi32> to vector<2x12x50xf32>
    %7 = vector.shape_cast %6 : vector<2x12x50xf32> to vector<24x50xf32>
    %8 = arith.truncf %7 : vector<24x50xf32> to vector<24x50xbf16>
    %c0_1 = arith.constant 0 : index
    %c0_2 = arith.constant 0 : index
    %9 = vector.load %arg2[%c0_1, %c0_2] : memref<50x128xbf16, #tpu.memory_space<vmem>>, vector<50x128xbf16>
    %cst = arith.constant dense<0.000000e+00> : vector<24x128xf32>
    %10 = tpu.matmul %8, %9, %cst {dimension_numbers = #tpu.dot_dimension_numbers<[1], [0], [0], [1], [0, 0, 1, 1], [], []>} : vector<24x50xbf16>, vector<50x128xbf16>, vector<24x128xf32> -> vector<24x128xf32>
    %11 = vector.shape_cast %10 : vector<24x128xf32> to vector<2x12x128xf32>
    %cst_3 = arith.constant 0.000000e+00 : f32
    %12 = vector.broadcast %cst_3 : f32 to vector<2x128xf32>
    %13 = vector.extract_strided_slice %11 {offsets = [0, 0, 0], sizes = [2, 11, 128], strides = [1, 1, 1]} : vector<2x12x128xf32> to vector<2x11x128xf32>
    %14 = vector.extract_strided_slice %11 {offsets = [0, 1, 0], sizes = [2, 11, 128], strides = [1, 1, 1]} : vector<2x12x128xf32> to vector<2x11x128xf32>
    %15 = tpu.concatenate %13, %14 in 2 : vector<2x11x128xf32>, vector<2x11x128xf32> -> vector<2x11x256xf32>
    %16 = vector.shape_cast %15 : vector<2x11x256xf32> to vector<22x256xf32>
    %17 = arith.truncf %16 : vector<22x256xf32> to vector<22x256xbf16>
    %c0_4 = arith.constant 0 : index
    %c0_5 = arith.constant 0 : index
    %18 = vector.load %arg3[%c0_4, %c0_5] : memref<256x128xbf16, #tpu.memory_space<vmem>>, vector<256x128xbf16>
    %cst_6 = arith.constant dense<0.000000e+00> : vector<22x128xf32>
    %19 = tpu.matmul %17, %18, %cst_6 {dimension_numbers = #tpu.dot_dimension_numbers<[1], [0], [0], [1], [0, 0, 1, 1], [], []>} : vector<22x256xbf16>, vector<256x128xbf16>, vector<22x128xf32> -> vector<22x128xf32>
    %20 = vector.shape_cast %19 : vector<22x128xf32> to vector<2x11x128xf32>
    %cst_7 = arith.constant dense<0xFF800000> : vector<2x128xf32>
    %21 = vector.multi_reduction <maximumf>, %20, %cst_7 [1] : vector<2x11x128xf32> to vector<2x128xf32>
    %c0_8 = arith.constant 0 : index
    %c0_9 = arith.constant 0 : index
    %22 = vector.load %arg6[%c0_8, %c0_9] : memref<3x128xf32, #tpu.memory_space<vmem>>, vector<1x128xf32>
    %23 = vector.broadcast %22 : vector<1x128xf32> to vector<2x128xf32>
    %24 = arith.addf %21, %23 : vector<2x128xf32>
    %cst_10 = arith.constant 0.000000e+00 : f32
    %25 = vector.broadcast %cst_10 : f32 to vector<2x128xf32>
    %26 = arith.maximumf %24, %25 : vector<2x128xf32>
    %c0_11 = arith.constant 0 : index
    %c0_12 = arith.constant 0 : index
    %27 = vector.load %arg7[%c0_11, %c0_12] : memref<384x128xbf16, #tpu.memory_space<vmem>>, vector<128x128xbf16>
    %28 = arith.truncf %26 : vector<2x128xf32> to vector<2x128xbf16>
    %cst_13 = arith.constant dense<0.000000e+00> : vector<2x128xf32>
    %29 = tpu.matmul %28, %27, %cst_13 {dimension_numbers = #tpu.dot_dimension_numbers<[1], [0], [0], [1], [0, 0, 1, 1], [], []>} : vector<2x128xbf16>, vector<128x128xbf16>, vector<2x128xf32> -> vector<2x128xf32>
    %30 = arith.addf %12, %29 : vector<2x128xf32>
    %31 = vector.extract_strided_slice %11 {offsets = [0, 0, 0], sizes = [2, 10, 128], strides = [1, 1, 1]} : vector<2x12x128xf32> to vector<2x10x128xf32>
    %32 = vector.extract_strided_slice %11 {offsets = [0, 1, 0], sizes = [2, 10, 128], strides = [1, 1, 1]} : vector<2x12x128xf32> to vector<2x10x128xf32>
    %33 = vector.extract_strided_slice %11 {offsets = [0, 2, 0], sizes = [2, 10, 128], strides = [1, 1, 1]} : vector<2x12x128xf32> to vector<2x10x128xf32>
    %34 = tpu.concatenate %31, %32, %33 in 2 : vector<2x10x128xf32>, vector<2x10x128xf32>, vector<2x10x128xf32> -> vector<2x10x384xf32>
    %35 = vector.shape_cast %34 : vector<2x10x384xf32> to vector<20x384xf32>
    %36 = arith.truncf %35 : vector<20x384xf32> to vector<20x384xbf16>
    %c0_14 = arith.constant 0 : index
    %c0_15 = arith.constant 0 : index
    %37 = vector.load %arg4[%c0_14, %c0_15] : memref<384x128xbf16, #tpu.memory_space<vmem>>, vector<384x128xbf16>
    %cst_16 = arith.constant dense<0.000000e+00> : vector<20x128xf32>
    %38 = tpu.matmul %36, %37, %cst_16 {dimension_numbers = #tpu.dot_dimension_numbers<[1], [0], [0], [1], [0, 0, 1, 1], [], []>} : vector<20x384xbf16>, vector<384x128xbf16>, vector<20x128xf32> -> vector<20x128xf32>
    %39 = vector.shape_cast %38 : vector<20x128xf32> to vector<2x10x128xf32>
    %cst_17 = arith.constant dense<0xFF800000> : vector<2x128xf32>
    %40 = vector.multi_reduction <maximumf>, %39, %cst_17 [1] : vector<2x10x128xf32> to vector<2x128xf32>
    %c1 = arith.constant 1 : index
    %c0_18 = arith.constant 0 : index
    %41 = vector.load %arg6[%c1, %c0_18] : memref<3x128xf32, #tpu.memory_space<vmem>>, vector<1x128xf32>
    %42 = vector.broadcast %41 : vector<1x128xf32> to vector<2x128xf32>
    %43 = arith.addf %40, %42 : vector<2x128xf32>
    %cst_19 = arith.constant 0.000000e+00 : f32
    %44 = vector.broadcast %cst_19 : f32 to vector<2x128xf32>
    %45 = arith.maximumf %43, %44 : vector<2x128xf32>
    %c128 = arith.constant 128 : index
    %c0_20 = arith.constant 0 : index
    %46 = vector.load %arg7[%c128, %c0_20] : memref<384x128xbf16, #tpu.memory_space<vmem>>, vector<128x128xbf16>
    %47 = arith.truncf %45 : vector<2x128xf32> to vector<2x128xbf16>
    %cst_21 = arith.constant dense<0.000000e+00> : vector<2x128xf32>
    %48 = tpu.matmul %47, %46, %cst_21 {dimension_numbers = #tpu.dot_dimension_numbers<[1], [0], [0], [1], [0, 0, 1, 1], [], []>} : vector<2x128xbf16>, vector<128x128xbf16>, vector<2x128xf32> -> vector<2x128xf32>
    %49 = arith.addf %30, %48 : vector<2x128xf32>
    %50 = vector.extract_strided_slice %11 {offsets = [0, 0, 0], sizes = [2, 9, 128], strides = [1, 1, 1]} : vector<2x12x128xf32> to vector<2x9x128xf32>
    %51 = vector.extract_strided_slice %11 {offsets = [0, 1, 0], sizes = [2, 9, 128], strides = [1, 1, 1]} : vector<2x12x128xf32> to vector<2x9x128xf32>
    %52 = vector.extract_strided_slice %11 {offsets = [0, 2, 0], sizes = [2, 9, 128], strides = [1, 1, 1]} : vector<2x12x128xf32> to vector<2x9x128xf32>
    %53 = vector.extract_strided_slice %11 {offsets = [0, 3, 0], sizes = [2, 9, 128], strides = [1, 1, 1]} : vector<2x12x128xf32> to vector<2x9x128xf32>
    %54 = tpu.concatenate %50, %51, %52, %53 in 2 : vector<2x9x128xf32>, vector<2x9x128xf32>, vector<2x9x128xf32>, vector<2x9x128xf32> -> vector<2x9x512xf32>
    %55 = vector.shape_cast %54 : vector<2x9x512xf32> to vector<18x512xf32>
    %56 = arith.truncf %55 : vector<18x512xf32> to vector<18x512xbf16>
    %c0_22 = arith.constant 0 : index
    %c0_23 = arith.constant 0 : index
    %57 = vector.load %arg5[%c0_22, %c0_23] : memref<512x128xbf16, #tpu.memory_space<vmem>>, vector<512x128xbf16>
    %cst_24 = arith.constant dense<0.000000e+00> : vector<18x128xf32>
    %58 = tpu.matmul %56, %57, %cst_24 {dimension_numbers = #tpu.dot_dimension_numbers<[1], [0], [0], [1], [0, 0, 1, 1], [], []>} : vector<18x512xbf16>, vector<512x128xbf16>, vector<18x128xf32> -> vector<18x128xf32>
    %59 = vector.shape_cast %58 : vector<18x128xf32> to vector<2x9x128xf32>
    %cst_25 = arith.constant dense<0xFF800000> : vector<2x128xf32>
    %60 = vector.multi_reduction <maximumf>, %59, %cst_25 [1] : vector<2x9x128xf32> to vector<2x128xf32>
    %c2 = arith.constant 2 : index
    %c0_26 = arith.constant 0 : index
    %61 = vector.load %arg6[%c2, %c0_26] : memref<3x128xf32, #tpu.memory_space<vmem>>, vector<1x128xf32>
    %62 = vector.broadcast %61 : vector<1x128xf32> to vector<2x128xf32>
    %63 = arith.addf %60, %62 : vector<2x128xf32>
    %cst_27 = arith.constant 0.000000e+00 : f32
    %64 = vector.broadcast %cst_27 : f32 to vector<2x128xf32>
    %65 = arith.maximumf %63, %64 : vector<2x128xf32>
    %c256 = arith.constant 256 : index
    %c0_28 = arith.constant 0 : index
    %66 = vector.load %arg7[%c256, %c0_28] : memref<384x128xbf16, #tpu.memory_space<vmem>>, vector<128x128xbf16>
    %67 = arith.truncf %65 : vector<2x128xf32> to vector<2x128xbf16>
    %cst_29 = arith.constant dense<0.000000e+00> : vector<2x128xf32>
    %68 = tpu.matmul %67, %66, %cst_29 {dimension_numbers = #tpu.dot_dimension_numbers<[1], [0], [0], [1], [0, 0, 1, 1], [], []>} : vector<2x128xbf16>, vector<128x128xbf16>, vector<2x128xf32> -> vector<2x128xf32>
    %69 = arith.addf %49, %68 : vector<2x128xf32>
    %c0_30 = arith.constant 0 : index
    %c0_31 = arith.constant 0 : index
    %70 = vector.load %arg8[%c0_30, %c0_31] : memref<1x128xf32, #tpu.memory_space<vmem>>, vector<1x128xf32>
    %71 = vector.broadcast %70 : vector<1x128xf32> to vector<2x128xf32>
    %72 = arith.addf %69, %71 : vector<2x128xf32>
    %73 = arith.truncf %72 : vector<2x128xf32> to vector<2x128xbf16>
    %c0_32 = arith.constant 0 : index
    %c0_33 = arith.constant 0 : index
    %74 = vector.load %arg9[%c0_32, %c0_33] : memref<128x128xbf16, #tpu.memory_space<vmem>>, vector<128x128xbf16>
    %cst_34 = arith.constant dense<0.000000e+00> : vector<2x128xf32>
    %75 = tpu.matmul %73, %74, %cst_34 {dimension_numbers = #tpu.dot_dimension_numbers<[1], [0], [0], [1], [0, 0, 1, 1], [], []>} : vector<2x128xbf16>, vector<128x128xbf16>, vector<2x128xf32> -> vector<2x128xf32>
    %c0_35 = arith.constant 0 : index
    %c0_36 = arith.constant 0 : index
    %76 = vector.load %arg10[%c0_35, %c0_36] : memref<1x128xf32, #tpu.memory_space<vmem>>, vector<1x128xf32>
    %77 = vector.broadcast %76 : vector<1x128xf32> to vector<2x128xf32>
    %78 = arith.addf %75, %77 : vector<2x128xf32>
    %c0_37 = arith.constant 0 : index
    %c0_38 = arith.constant 0 : index
    %79 = vector.load %arg11[%c0_37, %c0_38] : memref<2x128xf32, #tpu.memory_space<vmem>>, vector<2x128xf32>
    tpu.vector_store %arg11[%c0_37, %c0_38], %78 {strides = array<i32>} : memref<2x128xf32, #tpu.memory_space<vmem>>, vector<2x128xf32>,
    return
  }
  func.func @transform_0(%arg0: i32) -> (i32, i32) {
    %c0_i32 = arith.constant 0 : i32
    %c0_i32_0 = arith.constant 0 : i32
    return %arg0, %c0_i32 : i32, i32
  }
  func.func @transform_1(%arg0: i32) -> (i32, i32) {
    %c0_i32 = arith.constant 0 : i32
    %c0_i32_0 = arith.constant 0 : i32
    %c0_i32_1 = arith.constant 0 : i32
    return %c0_i32, %c0_i32_0 : i32, i32
  }
  func.func @transform_2(%arg0: i32) -> (i32, i32) {
    %c0_i32 = arith.constant 0 : i32
    %c0_i32_0 = arith.constant 0 : i32
    %c0_i32_1 = arith.constant 0 : i32
    return %c0_i32, %c0_i32_0 : i32, i32
  }
  func.func @transform_3(%arg0: i32) -> (i32, i32) {
    %c0_i32 = arith.constant 0 : i32
    %c0_i32_0 = arith.constant 0 : i32
    %c0_i32_1 = arith.constant 0 : i32
    return %c0_i32, %c0_i32_0 : i32, i32
  }
  func.func @transform_4(%arg0: i32) -> (i32, i32) {
    %c0_i32 = arith.constant 0 : i32
    %c0_i32_0 = arith.constant 0 : i32
    %c0_i32_1 = arith.constant 0 : i32
    return %c0_i32, %c0_i32_0 : i32, i32
  }
  func.func @transform_5(%arg0: i32) -> (i32, i32) {
    %c0_i32 = arith.constant 0 : i32
    %c0_i32_0 = arith.constant 0 : i32
    %c0_i32_1 = arith.constant 0 : i32
    return %c0_i32, %c0_i32_0 : i32, i32
  }
  func.func @transform_6(%arg0: i32) -> (i32, i32) {
    %c0_i32 = arith.constant 0 : i32
    %c0_i32_0 = arith.constant 0 : i32
    %c0_i32_1 = arith.constant 0 : i32
    return %c0_i32, %c0_i32_0 : i32, i32
  }
  func.func @transform_7(%arg0: i32) -> (i32, i32) {
    %c0_i32 = arith.constant 0 : i32
    %c0_i32_0 = arith.constant 0 : i32
    %c0_i32_1 = arith.constant 0 : i32
    return %c0_i32, %c0_i32_0 : i32, i32
  }
  func.func @transform_8(%arg0: i32) -> (i32, i32) {
    %c0_i32 = arith.constant 0 : i32
    %c0_i32_0 = arith.constant 0 : i32
    %c0_i32_1 = arith.constant 0 : i32
    return %c0_i32, %c0_i32_0 : i32, i32
  }
  func.func @transform_9(%arg0: i32) -> (i32, i32) {
    %c0_i32 = arith.constant 0 : i32
    %c0_i32_0 = arith.constant 0 : i32
    %c0_i32_1 = arith.constant 0 : i32
    return %c0_i32, %c0_i32_0 : i32, i32
  }
  func.func @transform_10(%arg0: i32) -> (i32, i32) {
    %c0_i32 = arith.constant 0 : i32
    %c0_i32_0 = arith.constant 0 : i32
    return %arg0, %c0_i32 : i32, i32
  }
}

</mosaic_0001>

<bundles_post_ra>
// kernel: cnn_forward.1
= control target key start
LH: loop header
LB: loop body
LE: loop exit
PB: predicated region body
PF: predicated region fallthrough
CT: control target
= control target key end

     0   :  { %15 = vsyncpa [#allocation3], 0  ;;  %s3340_s0 = inlined_call_operand.hbm [shape: s32[2,12], index: 0, kind: input, shape index: {}]   ;;  %s3341_s1 = inlined_call_operand.hbm [shape: bf16[50,128], index: 1, kind: input, shape index: {}]   ;;  %s3342_s2 = inlined_call_operand.hbm [shape: bf16[256,128], index: 2, kind: input, shape index: {}]   ;;  %s3343_s3 = inlined_call_operand.hbm [shape: bf16[384,128], index: 3, kind: input, shape index: {}]   ;;  %s3344_s4 = inlined_call_operand.hbm [shape: bf16[512,128], index: 4, kind: input, shape index: {}]   ;;  %s3345_s5 = inlined_call_operand.hbm [shape: f32[3,128], index: 5, kind: input, shape index: {}]   ;;  %s3346_s6 = inlined_call_operand.hbm [shape: bf16[384,128], index: 6, kind: input, shape index: {}]   ;;  %s3347_s7 = inlined_call_operand.vmem [shape: f32[1,128], index: 7, kind: input, shape index: {}]   ;;  %s3348_s8 = inlined_call_operand.hbm [shape: bf16[128,128], index: 8, kind: input, shape index: {}]   ;;  %s3349_s9 = inlined_call_operand.vmem [shape: f32[1,128], index: 9, kind: input, shape index: {}]   ;;  %s3350_s10 = inlined_call_operand.hbm [shape: f32[2,128], index: 10, kind: output, shape index: {}]  }
   0x1   :  { %16 = vsyncpa [#allocation6], 0 }
   0x2   :  { %17 = vsyncpa [#allocation9], 0 }
   0x3   :  { %18 = vsyncpa [#allocation12], 0 }
   0x4   :  { %19 = vsyncpa [#allocation15], 0  ;;  %s36_s15 = sshll.u32 %s3341_s1, 4  ;;  %s37_s15 = int_to_ptr.hbm [resolvable:$true] %s36_s15 }
   0x5   :  { %20 = vsyncpa [#allocation4], 0  ;;  %s2885_s16 = smov [#allocation5]   ;;  %s62_s20 = sshll.u32 %s3343_s3, 4  ;;  %s63_s20 = int_to_ptr.hbm [resolvable:$true] %s62_s20 }
   0x6   :  { %s38_s17 = sshll.u32 %s2885_s16, 4  ;;  %s2886_s21 = smov 64   ;;  %s39_s17 = int_to_ptr.vmem [resolvable:$true] %s38_s17 }
   0x7   :  { %s2887_s22 = smov 4   ;;  %s2888_s23 = smov [#allocation8]  }
   0x8   :  { %44 = dma.hbm_to_vmem [thread:$0]  %s37_s15, 448, %s39_s17, [#allocation6], %s2886_s21, %s2886_s21, %s2887_s22  }
   0x9   :  { %s64_s24 = sshll.u32 %s2888_s23, 4  ;;  %s89_s26 = sshll.u32 %s3345_s5, 4  ;;  %s65_s24 = int_to_ptr.vmem [resolvable:$true] %s64_s24  ;;  %s90_s26 = int_to_ptr.hbm [resolvable:$true] %s89_s26 }
   0xa   :  { %70 = dma.hbm_to_vmem [thread:$0]  %s63_s20, 3072, %s65_s24, [#allocation9], %s2886_s21, %s2886_s21, %s2887_s22  }
   0xb   :  { %s26_s28 = sshll.u32 %s3340_s0, 4  ;;  %s2889_s29 = smov [#allocation11]   ;;  %s27_s28 = int_to_ptr.hbm [resolvable:$true] %s26_s28 }
   0xc   :  { %s91_s30 = sshll.u32 %s2889_s29, 4  ;;  %s2890_s11 = smov [#allocation2]   ;;  %s92_s30 = int_to_ptr.vmem [resolvable:$true] %s91_s30 }
   0xd   :  { %94 = dma.hbm_to_vmem [thread:$0]  %s90_s26, 64, %s92_s30, [#allocation12]  }
   0xe   :  { %s28_s12 = sshll.u32 %s2890_s11, 4  ;;  %s49_s5 = sshll.u32 %s3342_s2, 4  ;;  %s29_s12 = int_to_ptr.vmem [resolvable:$true] %s28_s12  ;;  %s50_s5 = int_to_ptr.hbm [resolvable:$true] %s49_s5 }
   0xf   :  { %31 = dma.hbm_to_vmem [thread:$0]  %s27_s28, 32, %s29_s12, [#allocation3]  }
  0x10   :  { %s75_s17 = sshll.u32 %s3344_s4, 4  ;;  %s2891_s18 = smov [#allocation7]   ;;  %s76_s17 = int_to_ptr.hbm [resolvable:$true] %s75_s17 }
  0x11   :  { %s51_s0 = sshll.u32 %s2891_s18, 4  ;;  %s2892_s19 = smov [#allocation10]   ;;  %s52_s0 = int_to_ptr.vmem [resolvable:$true] %s51_s0 }
  0x12   :  { %57 = dma.hbm_to_vmem [thread:$0]  %s50_s5, 2048, %s52_s0, [#allocation6], %s2886_s21, %s2886_s21, %s2887_s22  }
  0x13   :  { %s77_s20 = sshll.u32 %s2892_s19, 4  ;;  %s99_s2 = sshll.u32 %s3346_s6, 4  ;;  %s78_s20 = int_to_ptr.vmem [resolvable:$true] %s77_s20  ;;  %s100_s2 = int_to_ptr.hbm [resolvable:$true] %s99_s2 }
  0x14   :  { %83 = dma.hbm_to_vmem [thread:$0]  %s76_s17, 4096, %s78_s20, [#allocation9], %s2886_s21, %s2886_s21, %s2887_s22  }
  0x15   :  { %s114_s1 = sshll.u32 %s3348_s8, 4  ;;  %s2893_s26 = smov [#allocation13]   ;;  %s115_s1 = int_to_ptr.hbm [resolvable:$true] %s114_s1 }
  0x16   :  { %s101_s3 = sshll.u32 %s2893_s26, 4  ;;  %s2894_s27 = smov [#allocation14]   ;;  %s102_s3 = int_to_ptr.vmem [resolvable:$true] %s101_s3 }
  0x17   :  { %107 = dma.hbm_to_vmem [thread:$0]  %s100_s2, 3072, %s102_s3, [#allocation12], %s2886_s21, %s2886_s21, %s2887_s22  }
  0x18   :  { %s116_s6 = sshll.u32 %s2894_s27, 4  ;;  %s117_s6 = int_to_ptr.vmem [resolvable:$true] %s116_s6 }
  0x19   :  { %122 = dma.hbm_to_vmem [thread:$0]  %s115_s1, 1024, %s117_s6, [#allocation15], %s2886_s21, %s2886_s21, %s2887_s22  }
  0x1a   :  { %2873 = dma.done.wait [#allocation3], 32  }
  0x1b   :  { %2874 = vsyncadd [#allocation3], 4294967264 }
  0x1c   :  { %2875 = dma.done.wait [#allocation6], 2496  }
  0x1d   :  { %2876 = vsyncadd [#allocation6], 4294964800 }
  0x1e   :  { %2877 = dma.done.wait [#allocation9], 7168  }
  0x1f   :  { %2878 = vsyncadd [#allocation9], 4294960128 }
  0x20   :  { %2879 = dma.done.wait [#allocation12], 3136  }
  0x21   :  { %2880 = vsyncadd [#allocation12], 4294964160 }
  0x22   :  { %2881 = dma.done.wait [#allocation15], 1024  }
  0x23   :  { %2882 = vsyncadd [#allocation15], 4294966272  ;;  %v159_v0 = vlaneseq  ;;  %v158_v2 = vld [vmem:[#allocation2] sm:$0x3]  ;;  %v230_v6 = vld [vmem:[#allocation5 + $0x18] sm:$0x1] }
  0x24   :  { %v161_v3 = vperm.slane %v158_v2, 0  ;;  %v174_v4 = vperm.slane %v158_v2, 1  ;;  %v244_v7 = vunpack.c.l.b16 %v230_v6  ;;  %vm259_vm0 = vcmask 1040384   ;;  %v2531_v10 = vld [vmem:[#allocation5 + $0x10] sm:$0xff]  ;;  %v2530_v11 = vld [vmem:[#allocation5 + $0x8] sm:$0xff]  ;;  %v2529_v12 = vld [vmem:[#allocation5] sm:$0xff] }
  0x25   :  { %v163_v1 = vshrl.u32 %v159_v0, 7  ;;  %v160_v13 = vand.u32 127, %v159_v0  ;;  %v2895_v16 = vmov 0.0   ;;  %vm252_vm5 = vcmask 408576   ;;  %v2539_v32 = vld [vmem:[#allocation7 + $0x38] sm:$0xff]  ;;  %v2538_v37 = vld [vmem:[#allocation7 + $0x30] sm:$0xff] }
  0x26   :  { %v248_v8 = vpack.c.b16 %v244_v7, %v244_v7  ;;  %v2547_v33 = vld [vmem:[#allocation7 + $0x78] sm:$0xff]  ;;  %547 = vmatpush.bf16.msra.mxu1 %v2539_v32  ;;  %v2546_v38 = vld [vmem:[#allocation7 + $0x70] sm:$0xff]  ;;  %v2537_v39 = vld [vmem:[#allocation7 + $0x28] sm:$0xff]  ;;  %vm317_vm6 = vcmask 1046528   ;;  %vm332_vm7 = vcmask 1042434   ;;  %vm329_vm8 = vcmask 1041409  }
  0x27   :  { %2648 = vset.pattern.permute.xlu0 %v163_v1  ;;  %2650 = vset.pattern.permute.xlu1 %v163_v1  ;;  %v170_v5 = vadd.s32 8, %v163_v1  ;;  %v2545_v40 = vld [vmem:[#allocation7 + $0x68] sm:$0xff]  ;;  %v2536_v44 = vld [vmem:[#allocation7 + $0x20] sm:$0xff]  ;;  %v2535_v47 = vld [vmem:[#allocation7 + $0x18] sm:$0xff]  ;;  %vm335_vm9 = vcmask 1043459   ;;  %vm338_vm10 = vcmask 1044484  }
  0x28   :  { %v261_v9 = vsel %vm259_vm0, %v248_v8, 0  ;;  %565 = vmatpush.bf16.msra.mxu2 %v2547_v33  ;;  %v2544_v45 = vld [vmem:[#allocation7 + $0x60] sm:$0xff]  ;;  %v2543_v48 = vld [vmem:[#allocation7 + $0x58] sm:$0xff]  ;;  %v2534_v56 = vld [vmem:[#allocation7 + $0x10] sm:$0xff]  ;;  %vm341_vm11 = vcmask 1045509   ;;  %vm344_vm12 = vcmask 1046534  }
  0x29   :  { %267 = vmatpush.bf16.msra.mxu0 %v261_v9  ;;  %v2542_v57 = vld [vmem:[#allocation7 + $0x50] sm:$0xff]  ;;  %v2533_v61 = vld [vmem:[#allocation7 + $0x8] sm:$0xff]  ;;  %vm642_vm13 = vcmask 1042432   ;;  %vm749_vm14 = vcmask 1041408   ;;  %vm751_vm15 = vcmask 1043456   ;;  %s2896_s29 = smov [#allocation16]  }
  0x2a   :  { %548 = vmatpush.bf16.msra.mxu1 %v2538_v37  ;;  %v2541_v62 = vld [vmem:[#allocation7 + $0x48] sm:$0xff]  ;;  %s2079_s30 = sshll.u32 %s2896_s29, 4  ;;  %s2081_s13 = sshll.u32 %s3350_s10, 4  ;;  %s2080_s30 = int_to_ptr.vmem [resolvable:$true] %s2079_s30  ;;  %s2082_s13 = int_to_ptr.hbm [resolvable:$true] %s2081_s13 }
  0x2c   :  { %566 = vmatpush.bf16.msra.mxu2 %v2546_v38 }
  0x2d   :  { %268 = vmatpush.bf16.msra.mxu0 %v2531_v10  ;;  %v2532_v10 = vld [vmem:[#allocation7] sm:$0xff] }
  0x2e   :  { %549 = vmatpush.bf16.msra.mxu1 %v2537_v39 }
  0x2f   :  { %166 = vperm.xlu0 %2648, %v161_v3   ;;  %179 = vperm.xlu1 %2650, %v174_v4  }
  0x30   :  { %567 = vmatpush.bf16.msra.mxu2 %v2545_v40 }
  0x31   :  { %269 = vmatpush.bf16.msra.mxu0 %v2530_v11  ;;  %v2540_v11 = vld [vmem:[#allocation7 + $0x40] sm:$0xff] }
  0x32   :  { %550 = vmatpush.bf16.msra.mxu1 %v2536_v44 }
  0x34   :  { %568 = vmatpush.bf16.msra.mxu2 %v2544_v45 }
  0x35   :  { %270 = vmatpush.bf16.msra.mxu0 %v2529_v12 }
  0x36   :  { %551 = vmatpush.bf16.msra.mxu1 %v2535_v47 }
  0x37   :  { %2649 = vset.pattern.permute.xlu0 %v170_v5  ;;  %2651 = vset.pattern.permute.xlu1 %v170_v5 }
  0x38   :  { %569 = vmatpush.bf16.msra.mxu2 %v2543_v48 }
  0x3a   :  { %552 = vmatpush.bf16.msra.mxu1 %v2534_v56 }
  0x3c   :  { %570 = vmatpush.bf16.msra.mxu2 %v2542_v57 }
  0x3e   :  { %553 = vmatpush.bf16.msra.mxu1 %v2533_v61 }
  0x3f   :  { %172 = vperm.xlu0 %2649, %v161_v3   ;;  %185 = vperm.xlu1 %2651, %v174_v4  }
  0x40   :  { %571 = vmatpush.bf16.msra.mxu2 %v2541_v62 }
  0x42   :  { %554 = vmatpush.bf16.msra.mxu1 %v2532_v10 }
  0x44   :  { %572 = vmatpush.bf16.msra.mxu2 %v2540_v11 }
  0xa1   :  { %v167_v14 = vpop.permute.xlu0 %166  ;;  %v180_v15 = vpop.permute.xlu1 %179 }
  0xa2   :  { %vm187_vm1 = vcmp.eq.s32.totalorder %v167_v14, %v160_v13  ;;  %vm189_vm2 = vcmp.eq.s32.totalorder %v180_v15, %v160_v13 }
  0xa3   :  { %v2095_v17 = vsel %vm187_vm1, 1.0, %v2895_v16  ;;  %v2097_v18 = vsel %vm189_vm2, 1.0, %v2895_v16  ;;  %vm734_vm1 = vcmask 1045504   ;;  %vm753_vm2 = vcmask 1043458  }
  0xa4   :  { %v203_v19 = vrot.slane %v2095_v17, 4  ;;  %205 = vst [vmem:[#allocation1] ss:$2 sm:$0xff] %v2095_v17  ;;  %v204_v20 = vrot.slane %v2097_v18, 4 }
  0xa5   :  { %211 = vst [vmem:[#allocation1 + $0x11] ss:$2 sm:$0xff] %v2097_v18 }
  0xa6   :  { %207 = vst [vmem:[#allocation1 + $0x1] ss:$2 sm:$0xff] %v203_v19 }
  0xa7   :  { %213 = vst [vmem:[#allocation1 + $0x20] ss:$2 sm:$0xff] %v204_v20 }
  0xad   :  { %v216_v25 = vld.sshfl [vmem:[#allocation1] sm:$0xff pattern:$0x75316420] }
  0xb1   :  { %v173_v21 = vpop.permute.xlu0 %172  ;;  %v186_v22 = vpop.permute.xlu1 %185 }
  0xb2   :  { %vm188_vm3 = vcmp.eq.s32.totalorder %v173_v21, %v160_v13  ;;  %vm190_vm4 = vcmp.eq.s32.totalorder %v186_v22, %v160_v13 }
  0xb3   :  { %v2096_v23 = vsel %vm188_vm3, 1.0, %v2895_v16  ;;  %v2098_v24 = vsel %vm190_vm4, 1.0, %v2895_v16  ;;  %vm758_vm3 = vcmask 1045508   ;;  %vm755_vm4 = vcmask 1045506  }
  0xb4   :  { %209 = vst [vmem:[#allocation1 + $0x10] ss:$2 sm:$0xff] %v2096_v23 }
  0xb5   :  { %215 = vst [vmem:[#allocation1 + $0x21] ss:$2 sm:$0xff] %v2098_v24 }
  0xbb   :  { %v217_v26 = vld.sshfl [vmem:[#allocation1 + $0x10] sm:$0xff pattern:$0x75316420] }
  0xbc   :  { %v222_v27 = vpack.c.bf16 %v217_v26, %v216_v25  ;;  %v218_v28 = vld.sshfl [vmem:[#allocation1 + $0x20] sm:$0xff pattern:$0x75316420] }
  0xbd   :  { %v223_v29 = vpack.c.bf16 %v218_v28, %v218_v28 }
  0xbe   :  { %2111 = vmatmul.msk.bf16.vlgmr.msra.gmra.mxu0 %vm252_vm5, %v222_v27 }
  0xce   :  { %2112 = vmatmul.msk.bf16.gmra.mxu0 %vm252_vm5, %v223_v29  ;;  %vm3351_vm5 = vcmask 1044480  }
 0x13b   :  { %v2995_v30 = vpop.f32.mrf.mxu0 }
 0x13c   :  { %v2998_v31 = vrot.slane %v2995_v30, 4  ;;  %287 = vst [vmem:[#allocation1] ss:$2 sm:$0xff] %v2995_v30 }
 0x13e   :  { %289 = vst [vmem:[#allocation1 + $0x1] ss:$2 sm:$0xff] %v2998_v31 }
 0x143   :  { %v3002_v34 = vpop.f32.mrf.mxu0 }
 0x144   :  { %v3005_v35 = vrot.slane %v3002_v34, 4  ;;  %291 = vst [vmem:[#allocation1 + $0x10] ss:$2 sm:$0xff] %v3002_v34 }
 0x145   :  { %v3008_v36 = vld.sshfl [vmem:[#allocation1] sm:$0xff pattern:$0x75316420] }
 0x146   :  { %302 = vst [vmem:[#allocation1] ss:$2 sm:$0xff] %v2995_v30 }
 0x147   :  { %304 = vst [vmem:[#allocation1 + $0x1] ss:$2 sm:$0xff] %v2998_v31 }
 0x148   :  { %295 = vst [vmem:[#allocation1 + $0x20] ss:$2 sm:$0xff] %v3005_v35 }
 0x14b   :  { %v3013_v41 = vld.sshfl [vmem:[#allocation1 + $0x10] sm:$0xff pattern:$0x75316420]  ;;  %v3015_v42 = vpop.f32.mrf.mxu0 }
 0x14c   :  { %306 = vst [vmem:[#allocation1 + $0x10] ss:$2 sm:$0xff] %v3002_v34  ;;  %v3019_v43 = vrot.slane %v3015_v42, 4 }
 0x14d   :  { %297 = vst [vmem:[#allocation1 + $0x21] ss:$2 sm:$0xff] %v3015_v42 }
 0x14e   :  { %299 = vst [vmem:[#allocation1 + $0x30] ss:$2 sm:$0xff] %v3019_v43  ;;  %v307_v46 = vld.sshfl [vmem:[#allocation1] sm:$0xff pattern:$0x75316420] }
 0x14f   :  { %v318_v51 = vrot.slane %v307_v46, 1 }
 0x153   :  { %v308_v49 = vld.sshfl [vmem:[#allocation1 + $0x10] sm:$0xff pattern:$0x75316420]  ;;  %v279_v50 = vpop.f32.mrf.mxu0 }
 0x154   :  { %v319_v52 = vrot.slane %v308_v49, 1  ;;  %v3023_v53 = vld.sshfl [vmem:[#allocation1 + $0x20] sm:$0xff pattern:$0x75316420] }
 0x155   :  { %v3025_v54 = vld.sshfl [vmem:[#allocation1 + $0x30] sm:$0xff pattern:$0x75316420]  ;;  %310 = vst [vmem:[#allocation1 + $0x20] ss:$2 sm:$0xff] %v3005_v35 }
 0x156   :  { %312 = vst [vmem:[#allocation1 + $0x21] ss:$2 sm:$0xff] %v3015_v42  ;;  %v320_v55 = vsel %vm317_vm6, %v318_v51, %v319_v52  ;;  %v325_v19 = vrot.slane %v319_v52, 7 }
 0x157   :  { %314 = vst [vmem:[#allocation1 + $0x30] ss:$2 sm:$0xff] %v3019_v43  ;;  %v324_v58 = vrot.slane %v320_v55, 7 }
 0x158   :  { %v350_v21 = vsel %vm329_vm8, %v3013_v41, %v325_v19  ;;  %v352_v22 = vsel %vm332_vm7, %v3013_v41, %v325_v19  ;;  %v349_v25 = vsel %vm259_vm0, %v3013_v41, %v325_v19 }
 0x159   :  { %v333_v59 = vsel %vm332_vm7, %v3008_v36, %v324_v58  ;;  %v330_v63 = vsel %vm329_vm8, %v3008_v36, %v324_v58  ;;  %v336_v0 = vsel %vm335_vm9, %v3008_v36, %v324_v58  ;;  %v339_v2 = vsel %vm338_vm10, %v3008_v36, %v324_v58 }
 0x15a   :  { %v334_v60 = vrot.slane %v333_v59, 2  ;;  %v328_v4 = vsel %vm259_vm0, %v3008_v36, %v324_v58  ;;  %v331_v5 = vrot.slane %v330_v63, 1  ;;  %v342_v6 = vsel %vm341_vm11, %v3008_v36, %v324_v58 }
 0x15b   :  { %v337_v8 = vrot.slane %v336_v0, 3  ;;  %v345_v9 = vsel %vm344_vm12, %v3008_v36, %v324_v58  ;;  %v340_v12 = vrot.slane %v339_v2, 4  ;;  %v347_v13 = vsel %vm317_vm6, %v324_v58, %v3008_v36 }
 0x15c   :  { %v343_v15 = vrot.slane %v342_v6, 5  ;;  %v346_v16 = vrot.slane %v345_v9, 6  ;;  %v348_v18 = vrot.slane %v347_v13, 7  ;;  %v351_v26 = vrot.slane %v350_v21, 1 }
 0x15d   :  { %v315_v1 = vld.sshfl [vmem:[#allocation1 + $0x20] sm:$0xff pattern:$0x75316420]  ;;  %v353_v32 = vrot.slane %v352_v22, 2 }
 0x15e   :  { %v316_v3 = vld.sshfl [vmem:[#allocation1 + $0x30] sm:$0xff pattern:$0x75316420]  ;;  %378 = vst [vmem:[#allocation1 + $0x2] ss:$9 sm:$0xff] %v334_v60  ;;  %v321_v14 = vrot.slane %v315_v1, 1 }
 0x15f   :  { %v322_v7 = vrot.slane %v316_v3, 1  ;;  %374 = vst [vmem:[#allocation1] ss:$9 sm:$0xff] %v328_v4 }
 0x160   :  { %376 = vst [vmem:[#allocation1 + $0x1] ss:$9 sm:$0xff] %v331_v5 }
 0x161   :  { %380 = vst [vmem:[#allocation1 + $0x3] ss:$9 sm:$0xff] %v337_v8  ;;  %v323_v17 = vsel %vm317_vm6, %v321_v14, %v322_v7  ;;  %v327_v41 = vrot.slane %v322_v7, 7 }
 0x162   :  { %382 = vst [vmem:[#allocation1 + $0x4] ss:$9 sm:$0xff] %v340_v12  ;;  %v326_v20 = vrot.slane %v323_v17, 7 }
 0x163   :  { %384 = vst [vmem:[#allocation1 + $0x5] ss:$9 sm:$0xff] %v343_v15  ;;  %v370_v49 = vsel %vm329_vm8, %v3025_v54, %v327_v41  ;;  %v372_v55 = vsel %vm332_vm7, %v3025_v54, %v327_v41  ;;  %v369_v58 = vsel %vm259_vm0, %v3025_v54, %v327_v41  ;;  %v2578_v41 = vld [vmem:[#allocation8 + $0xb0] sm:$0xff] }
 0x164   :  { %386 = vst [vmem:[#allocation1 + $0x6] ss:$9 sm:$0xff] %v346_v16  ;;  %v355_v23 = vsel %vm329_vm8, %v3023_v53, %v326_v20  ;;  %v357_v24 = vsel %vm332_vm7, %v3023_v53, %v326_v20  ;;  %v359_v27 = vsel %vm335_vm9, %v3023_v53, %v326_v20  ;;  %v361_v36 = vsel %vm338_vm10, %v3023_v53, %v326_v20 }
 0x165   :  { %388 = vst [vmem:[#allocation1 + $0x7] ss:$9 sm:$0xff] %v348_v18  ;;  %v356_v33 = vrot.slane %v355_v23, 1  ;;  %v358_v37 = vrot.slane %v357_v24, 2  ;;  %v354_v38 = vsel %vm259_vm0, %v3023_v53, %v326_v20  ;;  %v360_v39 = vrot.slane %v359_v27, 3 }
 0x166   :  { %v362_v40 = vrot.slane %v361_v36, 4  ;;  %v363_v44 = vsel %vm341_vm11, %v3023_v53, %v326_v20  ;;  %v365_v45 = vsel %vm344_vm12, %v3023_v53, %v326_v20  ;;  %v367_v46 = vsel %vm317_vm6, %v326_v20, %v3023_v53 }
 0x167   :  { %v364_v47 = vrot.slane %v363_v44, 5  ;;  %v366_v48 = vrot.slane %v365_v45, 6  ;;  %v368_v52 = vrot.slane %v367_v46, 7  ;;  %v371_v59 = vrot.slane %v370_v49, 1  ;;  %v2561_v44 = vld [vmem:[#allocation8 + $0x28] sm:$0xff]  ;;  %v2576_v49 = vld [vmem:[#allocation8 + $0xa0] sm:$0xff] }
 0x168   :  { %v373_v53 = vrot.slane %v372_v55, 2  ;;  %v2569_v45 = vld [vmem:[#allocation8 + $0x68] sm:$0xff]  ;;  %v2567_v55 = vld [vmem:[#allocation8 + $0x58] sm:$0xff] }
 0x169   :  { %v2577_v46 = vld [vmem:[#allocation8 + $0xa8] sm:$0xff] }
 0x16c   :  { %v389_v28 = vld [vmem:[#allocation1] sm:$0xff]  ;;  %v390_v29 = vld [vmem:[#allocation1 + $0x9] sm:$0xff] }
 0x16d   :  { %391 = vst [vmem:[#allocation1] ss:$9 sm:$0xff] %v349_v25 }
 0x16e   :  { %392 = vst [vmem:[#allocation1 + $0x1] ss:$9 sm:$0xff] %v351_v26 }
 0x16f   :  { %393 = vst [vmem:[#allocation1 + $0x2] ss:$9 sm:$0xff] %v353_v32  ;;  %v2579_v32 = vld [vmem:[#allocation8 + $0xb8] sm:$0xff] }
 0x170   :  { %394 = vst [vmem:[#allocation1 + $0x3] ss:$9 sm:$0xff] %v354_v38  ;;  %1049 = vmatpush.bf16.msrb.mxu1 %v2579_v32  ;;  %v2562_v38 = vld [vmem:[#allocation8 + $0x30] sm:$0xff] }
 0x171   :  { %395 = vst [vmem:[#allocation1 + $0x4] ss:$9 sm:$0xff] %v356_v33 }
 0x172   :  { %396 = vst [vmem:[#allocation1 + $0x5] ss:$9 sm:$0xff] %v358_v37 }
 0x173   :  { %397 = vst [vmem:[#allocation1 + $0x6] ss:$9 sm:$0xff] %v360_v39  ;;  %v2570_v39 = vld [vmem:[#allocation8 + $0x70] sm:$0xff] }
 0x174   :  { %398 = vst [vmem:[#allocation1 + $0x7] ss:$9 sm:$0xff] %v362_v40  ;;  %1050 = vmatpush.bf16.msrb.mxu1 %v2578_v41 }
 0x178   :  { %1051 = vmatpush.bf16.msrb.mxu1 %v2577_v46 }
 0x17b   :  { %v399_v50 = vld [vmem:[#allocation1] sm:$0xff]  ;;  %v400_v51 = vld [vmem:[#allocation1 + $0x9] sm:$0xff] }
 0x17c   :  { %401 = vst [vmem:[#allocation1] ss:$9 sm:$0xff] %v364_v47  ;;  %v415_v56 = vpack.c.bf16 %v399_v50, %v389_v28  ;;  %v416_v57 = vpack.c.bf16 %v400_v51, %v390_v29  ;;  %v2563_v28 = vld [vmem:[#allocation8 + $0x38] sm:$0xff]  ;;  %v2560_v47 = vld [vmem:[#allocation8 + $0x20] sm:$0xff]  ;;  %1052 = vmatpush.bf16.msrb.mxu1 %v2576_v49 }
 0x17d   :  { %402 = vst [vmem:[#allocation1 + $0x1] ss:$9 sm:$0xff] %v366_v48  ;;  %v2571_v29 = vld [vmem:[#allocation8 + $0x78] sm:$0xff]  ;;  %1013 = vmatpush.bf16.msra.mxu3 %v2563_v28  ;;  %v2568_v48 = vld [vmem:[#allocation8 + $0x60] sm:$0xff] }
 0x17e   :  { %403 = vst [vmem:[#allocation1 + $0x2] ss:$9 sm:$0xff] %v368_v52  ;;  %555 = vmatmul.bf16.vlgmr.msra.gmra.mxu1 %v415_v56  ;;  %573 = vmatmul.bf16.vlgmr.msra.gmra.mxu2 %v416_v57  ;;  %v2559_v52 = vld [vmem:[#allocation8 + $0x18] sm:$0xff] }
 0x17f   :  { %404 = vst [vmem:[#allocation1 + $0x3] ss:$9 sm:$0xff] %v369_v58  ;;  %1031 = vmatpush.bf16.msrb.mxu0 %v2571_v29  ;;  %v2575_v56 = vld [vmem:[#allocation8 + $0x98] sm:$0xff] }
 0x180   :  { %405 = vst [vmem:[#allocation1 + $0x4] ss:$9 sm:$0xff] %v371_v59  ;;  %1053 = vmatpush.bf16.msrb.mxu1 %v2575_v56  ;;  %v2558_v59 = vld [vmem:[#allocation8 + $0x10] sm:$0xff] }
 0x181   :  { %406 = vst [vmem:[#allocation1 + $0x5] ss:$9 sm:$0xff] %v373_v53  ;;  %1014 = vmatpush.bf16.msra.mxu3 %v2562_v38  ;;  %v2566_v53 = vld [vmem:[#allocation8 + $0x50] sm:$0xff] }
 0x183   :  { %1032 = vmatpush.bf16.msrb.mxu0 %v2570_v39 }
 0x185   :  { %1015 = vmatpush.bf16.msra.mxu3 %v2561_v44 }
 0x187   :  { %1033 = vmatpush.bf16.msrb.mxu0 %v2569_v45 }
 0x188   :  { %v407_v60 = vld [vmem:[#allocation1] sm:$0xff]  ;;  %v408_v61 = vld [vmem:[#allocation1 + $0x9] sm:$0xff] }
 0x189   :  { %v417_v62 = vpack.c.bf16 %v407_v60, %v407_v60  ;;  %v418_v63 = vpack.c.bf16 %v408_v61, %v408_v61  ;;  %1016 = vmatpush.bf16.msra.mxu3 %v2560_v47  ;;  %v2574_v60 = vld [vmem:[#allocation8 + $0x90] sm:$0xff] }
 0x18a   :  { %1054 = vmatpush.bf16.msrb.mxu1 %v2574_v60 }
 0x18b   :  { %1034 = vmatpush.bf16.msrb.mxu0 %v2568_v48 }
 0x18d   :  { %1017 = vmatpush.bf16.msra.mxu3 %v2559_v52 }
 0x18e   :  { %560 = vmatmul.bf16.gmra.mxu1 %v417_v62  ;;  %578 = vmatmul.bf16.gmra.mxu2 %v418_v63  ;;  %v2557_v63 = vld [vmem:[#allocation8 + $0x8] sm:$0xff] }
 0x18f   :  { %1035 = vmatpush.bf16.msrb.mxu0 %v2567_v55 }
 0x191   :  { %1018 = vmatpush.bf16.msra.mxu3 %v2558_v59 }
 0x193   :  { %1036 = vmatpush.bf16.msrb.mxu0 %v2566_v53 }
 0x195   :  { %1019 = vmatpush.bf16.msra.mxu3 %v2557_v63 }
 0x1fb   :  { %v556_v0 = vpop.f32.mrf.mxu1 }
 0x201   :  { %v574_v1 = vpop.f32.mrf.mxu2 }
 0x202   :  { %v575_v2 = vadd.f32 %v574_v1, %v556_v0  ;;  %v2565_v0 = vld [vmem:[#allocation8 + $0x48] sm:$0xff] }
 0x203   :  { %v558_v3 = vpop.f32.mrf.mxu1  ;;  %v2573_v1 = vld [vmem:[#allocation8 + $0x88] sm:$0xff]  ;;  %1037 = vmatpush.bf16.msrb.mxu0 %v2565_v0 }
 0x204   :  { %v586_v4 = vrot.slane %v575_v2, 1  ;;  %v587_v54 = vrot.slane %v575_v2, 2  ;;  %v588_v5 = vrot.slane %v575_v2, 3  ;;  %605 = vst [vmem:[#allocation1] ss:$9 sm:$0xff] %v575_v2  ;;  %v589_v6 = vrot.slane %v575_v2, 4  ;;  %1055 = vmatpush.bf16.msrb.mxu1 %v2573_v1 }
 0x205   :  { %v590_v7 = vrot.slane %v575_v2, 5  ;;  %v591_v8 = vrot.slane %v575_v2, 6  ;;  %v592_v9 = vrot.slane %v575_v2, 7 }
 0x206   :  { %607 = vst [vmem:[#allocation1 + $0x1] ss:$9 sm:$0xff] %v586_v4  ;;  %v2556_v4 = vld [vmem:[#allocation8] sm:$0xff] }
 0x207   :  { %609 = vst [vmem:[#allocation1 + $0x2] ss:$9 sm:$0xff] %v587_v54  ;;  %v2564_v54 = vld [vmem:[#allocation8 + $0x40] sm:$0xff]  ;;  %1020 = vmatpush.bf16.msra.mxu3 %v2556_v4 }
 0x208   :  { %611 = vst [vmem:[#allocation1 + $0x3] ss:$9 sm:$0xff] %v588_v5  ;;  %v2572_v5 = vld [vmem:[#allocation8 + $0x80] sm:$0xff]  ;;  %1038 = vmatpush.bf16.msrb.mxu0 %v2564_v54 }
 0x209   :  { %613 = vst [vmem:[#allocation1 + $0x4] ss:$9 sm:$0xff] %v589_v6  ;;  %v576_v10 = vpop.f32.mrf.mxu2  ;;  %1056 = vmatpush.bf16.msrb.mxu1 %v2572_v5  ;;  %v2551_v4 = vld [vmem:[#allocation13 + $0x18] sm:$0xff] }
 0x20a   :  { %615 = vst [vmem:[#allocation1 + $0x5] ss:$9 sm:$0xff] %v590_v7  ;;  %v577_v12 = vadd.f32 %v576_v10, %v558_v3  ;;  %v2555_v10 = vld [vmem:[#allocation13 + $0x38] sm:$0xff] }
 0x20b   :  { %617 = vst [vmem:[#allocation1 + $0x6] ss:$9 sm:$0xff] %v591_v8  ;;  %v561_v11 = vpop.f32.mrf.mxu1  ;;  %1264 = vmatpush.bf16.msrb.mxu3 %v2555_v10 }
 0x20c   :  { %619 = vst [vmem:[#allocation1 + $0x7] ss:$9 sm:$0xff] %v592_v9  ;;  %v593_v13 = vrot.slane %v577_v12, 1  ;;  %v594_v15 = vrot.slane %v577_v12, 2  ;;  %v595_v19 = vrot.slane %v577_v12, 3  ;;  %v596_v21 = vrot.slane %v577_v12, 4 }
 0x20d   :  { %v597_v23 = vrot.slane %v577_v12, 5  ;;  %v598_v24 = vrot.slane %v577_v12, 6  ;;  %v599_v25 = vrot.slane %v577_v12, 7 }
 0x211   :  { %v579_v14 = vpop.f32.mrf.mxu2 }
 0x212   :  { %v580_v20 = vadd.f32 %v579_v14, %v561_v11 }
 0x213   :  { %v3076_v16 = vld [vmem:[#allocation1] sm:$0xff]  ;;  %v563_v17 = vpop.f32.mrf.mxu1 }
 0x214   :  { %621 = vst [vmem:[#allocation1] ss:$9 sm:$0xff] %v577_v12  ;;  %v600_v26 = vrot.slane %v580_v20, 1  ;;  %v601_v27 = vrot.slane %v580_v20, 2  ;;  %v602_v33 = vrot.slane %v580_v20, 3  ;;  %v603_v36 = vrot.slane %v580_v20, 4 }
 0x215   :  { %622 = vst [vmem:[#allocation1 + $0x1] ss:$9 sm:$0xff] %v593_v13  ;;  %v604_v40 = vrot.slane %v580_v20, 5 }
 0x216   :  { %623 = vst [vmem:[#allocation1 + $0x2] ss:$9 sm:$0xff] %v594_v15 }
 0x219   :  { %v581_v18 = vpop.f32.mrf.mxu2 }
 0x21d   :  { %v3078_v22 = vld [vmem:[#allocation1] sm:$0xff] }
 0x21e   :  { %625 = vst [vmem:[#allocation1] ss:$9 sm:$0xff] %v595_v19 }
 0x21f   :  { %626 = vst [vmem:[#allocation1 + $0x1] ss:$9 sm:$0xff] %v596_v21 }
 0x220   :  { %627 = vst [vmem:[#allocation1 + $0x2] ss:$9 sm:$0xff] %v597_v23 }
 0x221   :  { %628 = vst [vmem:[#allocation1 + $0x3] ss:$9 sm:$0xff] %v598_v24 }
 0x222   :  { %629 = vst [vmem:[#allocation1 + $0x4] ss:$9 sm:$0xff] %v599_v25 }
 0x223   :  { %630 = vst [vmem:[#allocation1 + $0x5] ss:$9 sm:$0xff] %v580_v20 }
 0x224   :  { %631 = vst [vmem:[#allocation1 + $0x6] ss:$9 sm:$0xff] %v600_v26  ;;  %v2554_v26 = vld [vmem:[#allocation13 + $0x30] sm:$0xff] }
 0x225   :  { %632 = vst [vmem:[#allocation1 + $0x7] ss:$9 sm:$0xff] %v601_v27  ;;  %1265 = vmatpush.bf16.msrb.mxu3 %v2554_v26 }
 0x22c   :  { %v3080_v37 = vld [vmem:[#allocation1] sm:$0xff] }
 0x22d   :  { %634 = vst [vmem:[#allocation1] ss:$9 sm:$0xff] %v602_v33  ;;  %v2553_v33 = vld [vmem:[#allocation13 + $0x28] sm:$0xff] }
 0x22e   :  { %635 = vst [vmem:[#allocation1 + $0x1] ss:$9 sm:$0xff] %v603_v36  ;;  %1266 = vmatpush.bf16.msrb.mxu3 %v2553_v33 }
 0x22f   :  { %636 = vst [vmem:[#allocation1 + $0x2] ss:$9 sm:$0xff] %v604_v40 }
 0x230   :  { %687 = vst [vmem:[#allocation1 + $0x10] ss:$2 sm:$0xff] %v3002_v34 }
 0x231   :  { %691 = vst [vmem:[#allocation1 + $0x20] ss:$2 sm:$0xff] %v3005_v35 }
 0x232   :  { %693 = vst [vmem:[#allocation1 + $0x21] ss:$2 sm:$0xff] %v3015_v42 }
 0x233   :  { %695 = vst [vmem:[#allocation1 + $0x30] ss:$2 sm:$0xff] %v3019_v43 }
 0x236   :  { %v637_v50 = vld [vmem:[#allocation1] sm:$0xff] }
 0x237   :  { %683 = vst [vmem:[#allocation1] ss:$2 sm:$0xff] %v2995_v30  ;;  %v3087_v51 = vld.sshfl [vmem:[#allocation1 + $0x10] sm:$0xff pattern:$0x75316420]  ;;  %v651_v12 = vsel %vm642_vm13, %v637_v50, -inf }
 0x238   :  { %685 = vst [vmem:[#allocation1 + $0x1] ss:$2 sm:$0xff] %v2998_v31  ;;  %v652_v23 = vmax.f32 %v3080_v37, %v651_v12  ;;  %v643_v37 = vsel %vm642_vm13, %v3078_v22, -inf  ;;  %vm1373_vm13 = vcmask 1042433  }
 0x239   :  { %v3090_v57 = vld.sshfl [vmem:[#allocation1 + $0x20] sm:$0xff pattern:$0x75316420]  ;;  %702 = vst [vmem:[#allocation1 + $0x10] ss:$2 sm:$0xff] %v3002_v34  ;;  %v644_v56 = vmax.f32 %v3076_v16, %v643_v37 }
 0x23a   :  { %v3093_v58 = vld.sshfl [vmem:[#allocation1 + $0x30] sm:$0xff pattern:$0x75316420]  ;;  %706 = vst [vmem:[#allocation1 + $0x20] ss:$2 sm:$0xff] %v3005_v35  ;;  %v653_v38 = vrot.slane %v652_v23, 4 }
 0x23b   :  { %708 = vst [vmem:[#allocation1 + $0x21] ss:$2 sm:$0xff] %v3015_v42  ;;  %v2652_v37 = vld [vmem:[#allocation11] ss:$0 sm:$0xff] }
 0x23c   :  { %710 = vst [vmem:[#allocation1 + $0x30] ss:$2 sm:$0xff] %v3019_v43  ;;  %v654_v59 = vmax.f32 %v652_v23, %v653_v38 }
 0x23f   :  { %v3098_v61 = vld.sshfl [vmem:[#allocation1] sm:$0xff pattern:$0x75316420] }
 0x240   :  { %698 = vst [vmem:[#allocation1] ss:$2 sm:$0xff] %v2995_v30  ;;  %v704_v62 = vld.sshfl [vmem:[#allocation1 + $0x10] sm:$0xff pattern:$0x75316420] }
 0x241   :  { %700 = vst [vmem:[#allocation1 + $0x1] ss:$2 sm:$0xff] %v2998_v31  ;;  %v714_v6 = vrot.slane %v704_v62, 1 }
 0x242   :  { %v711_v2 = vld.sshfl [vmem:[#allocation1 + $0x20] sm:$0xff pattern:$0x75316420]  ;;  %723 = vst [vmem:[#allocation1 + $0x10] ss:$2 sm:$0xff] %v3002_v34 }
 0x243   :  { %v3103_v3 = vld.sshfl [vmem:[#allocation1 + $0x30] sm:$0xff pattern:$0x75316420]  ;;  %727 = vst [vmem:[#allocation1 + $0x20] ss:$2 sm:$0xff] %v3005_v35  ;;  %v716_v7 = vrot.slane %v711_v2, 1 }
 0x244   :  { %729 = vst [vmem:[#allocation1 + $0x21] ss:$2 sm:$0xff] %v3015_v42  ;;  %v717_v8 = vrot.slane %v3103_v3, 1  ;;  %v743_v17 = vrot.slane %v714_v6, 6 }
 0x245   :  { %731 = vst [vmem:[#allocation1 + $0x30] ss:$2 sm:$0xff] %v3019_v43 }
 0x246   :  { %v718_v14 = vsel %vm317_vm6, %v716_v7, %v717_v8  ;;  %v765_v28 = vsel %vm749_vm14, %v3087_v51, %v743_v17  ;;  %v2552_v51 = vld [vmem:[#allocation13 + $0x20] sm:$0xff]  ;;  %v645_v7 = vrot.slane %v644_v56, 4 }
 0x247   :  { %v745_v25 = vrot.slane %v718_v14, 6  ;;  %1267 = vmatpush.bf16.msrb.mxu3 %v2552_v51  ;;  %v2549_v14 = vld [vmem:[#allocation13 + $0x8] sm:$0xff] }
 0x248   :  { %v703_v9 = vld.sshfl [vmem:[#allocation1] sm:$0xff pattern:$0x75316420] }
 0x249   :  { %719 = vst [vmem:[#allocation1] ss:$2 sm:$0xff] %v2995_v30  ;;  %v725_v11 = vld.sshfl [vmem:[#allocation1 + $0x10] sm:$0xff pattern:$0x75316420]  ;;  %v713_v13 = vrot.slane %v703_v9, 1  ;;  %v767_v41 = vsel %vm749_vm14, %v3090_v57, %v745_v25  ;;  %v769_v44 = vsel %vm753_vm2, %v3090_v57, %v745_v25  ;;  %v772_v45 = vsel %vm758_vm3, %v3090_v57, %v745_v25 }
 0x24a   :  { %721 = vst [vmem:[#allocation1 + $0x1] ss:$2 sm:$0xff] %v2998_v31  ;;  %v736_v15 = vrot.slane %v725_v11, 2  ;;  %v655_v9 = vrot.slane %v654_v59, 2  ;;  %v775_v10 = vsel %vm734_vm1, %v745_v25, %v3090_v57  ;;  %v646_v11 = vmax.f32 %v644_v56, %v645_v7 }
 0x24b   :  { %v732_v18 = vld.sshfl [vmem:[#allocation1 + $0x20] sm:$0xff pattern:$0x75316420]  ;;  %v715_v27 = vsel %vm317_vm6, %v713_v13, %v714_v6  ;;  %1268 = vmatpush.bf16.msrb.mxu3 %v2551_v4 }
 0x24c   :  { %v3115_v19 = vld.sshfl [vmem:[#allocation1 + $0x30] sm:$0xff pattern:$0x75316420]  ;;  %v738_v20 = vrot.slane %v732_v18, 2  ;;  %v744_v21 = vrot.slane %v736_v15, 4  ;;  %v741_v40 = vrot.slane %v715_v27, 6  ;;  %v656_v12 = vmax.f32 %v654_v59, %v655_v9 }
 0x24d   :  { %v739_v24 = vrot.slane %v3115_v19, 2 }
 0x24e   :  { %v766_v32 = vsel %vm751_vm15, %v765_v28, %v744_v21  ;;  %v750_v53 = vsel %vm749_vm14, %v3098_v61, %v741_v40  ;;  %v754_v60 = vsel %vm753_vm2, %v3098_v61, %v741_v40  ;;  %v759_v62 = vsel %vm758_vm3, %v3098_v61, %v741_v40 }
 0x24f   :  { %v740_v29 = vsel %vm734_vm1, %v738_v20, %v739_v24  ;;  %788 = vst [vmem:[#allocation1 + $0x20] ss:$4 sm:$0xff] %v766_v32  ;;  %v762_v63 = vsel %vm734_vm1, %v741_v40, %v3098_v61  ;;  %v2550_v61 = vld [vmem:[#allocation13 + $0x10] sm:$0xff]  ;;  %v748_v17 = vrot.slane %v739_v24, 4  ;;  %v2548_v20 = vld [vmem:[#allocation13] sm:$0xff]  ;;  %v647_v21 = vrot.slane %v646_v11, 2 }
 0x250   :  { %v746_v36 = vrot.slane %v740_v29, 4  ;;  %1269 = vmatpush.bf16.msrb.mxu3 %v2550_v61  ;;  %v657_v23 = vrot.slane %v656_v12, 1 }
 0x251   :  { %v724_v39 = vld.sshfl [vmem:[#allocation1] sm:$0xff pattern:$0x75316420]  ;;  %v648_v24 = vmax.f32 %v646_v11, %v647_v21 }
 0x252   :  { %v735_v46 = vrot.slane %v724_v39, 2  ;;  %v768_v47 = vsel %vm751_vm15, %v767_v41, %v746_v36  ;;  %v770_v48 = vsel %vm755_vm4, %v769_v44, %v746_v36  ;;  %v773_v49 = vsel %vm751_vm15, %v746_v36, %v772_v45 }
 0x253   :  { %v771_v22 = vrot.slane %v770_v48, 2  ;;  %v774_v50 = vrot.slane %v773_v49, 4  ;;  %790 = vst [vmem:[#allocation1 + $0x21] ss:$4 sm:$0xff] %v768_v47  ;;  %v776_v13 = vsel %vm755_vm4, %v746_v36, %v775_v10  ;;  %v658_v36 = vmax.f32 %v656_v12, %v657_v23  ;;  %v2585_v10 = vld [vmem:[#allocation13 + $0x68] sm:$0xff] }
 0x254   :  { %v737_v52 = vsel %vm734_vm1, %v735_v46, %v736_v15  ;;  %v747_v15 = vrot.slane %v717_v8, 6  ;;  %v777_v18 = vrot.slane %v776_v13, 6  ;;  %1270 = vmatpush.bf16.msrb.mxu3 %v2549_v14  ;;  %v649_v38 = vrot.slane %v648_v24, 1 }
 0x255   :  { %v742_v55 = vrot.slane %v737_v52, 4  ;;  %792 = vst [vmem:[#allocation1 + $0x22] ss:$4 sm:$0xff] %v771_v22  ;;  %v662_v39 = vadd.f32 %v2652_v37, %v658_v36 }
 0x256   :  { %794 = vst [vmem:[#allocation1 + $0x23] ss:$4 sm:$0xff] %v774_v50  ;;  %v778_v25 = vsel %vm749_vm14, %v3093_v58, %v747_v15  ;;  %v650_v40 = vmax.f32 %v648_v24, %v649_v38  ;;  %v2584_v15 = vld [vmem:[#allocation13 + $0x60] sm:$0xff] }
 0x257   :  { %v752_v0 = vsel %vm751_vm15, %v750_v53, %v742_v55  ;;  %v756_v1 = vsel %vm755_vm4, %v754_v60, %v742_v55  ;;  %v760_v16 = vsel %vm751_vm15, %v742_v55, %v759_v62  ;;  %v763_v2 = vsel %vm755_vm4, %v742_v55, %v762_v63 }
 0x258   :  { %v757_v54 = vrot.slane %v756_v1, 2  ;;  %v761_v5 = vrot.slane %v760_v16, 4  ;;  %v764_v6 = vrot.slane %v763_v2, 6  ;;  %780 = vst [vmem:[#allocation1] ss:$4 sm:$0xff] %v752_v0  ;;  %v779_v8 = vsel %vm751_vm15, %v778_v25, %v748_v17  ;;  %1271 = vmatpush.bf16.msrb.mxu3 %v2548_v20  ;;  %v2587_v0 = vld [vmem:[#allocation13 + $0x78] sm:$0xff] }
 0x259   :  { %v664_v58 = vmax.f32 %v662_v39, 0.0  ;;  %v661_v46 = vadd.f32 %v2652_v37, %v650_v40  ;;  %1195 = vmatpush.bf16.msrb.mxu2 %v2587_v0  ;;  %v2581_v39 = vld [vmem:[#allocation13 + $0x48] sm:$0xff]  ;;  %v2619_v0 = vld [vmem:[#allocation10 + $0xf8] sm:$0xff]  ;;  %vm1382_vm15 = vcmask 1044483   ;;  %vm3352_vm4 = vcmask 1046533  }
 0x25a   :  { %782 = vst [vmem:[#allocation1 + $0x1] ss:$4 sm:$0xff] %v757_v54  ;;  %v2586_v54 = vld [vmem:[#allocation13 + $0x70] sm:$0xff] }
 0x25b   :  { %784 = vst [vmem:[#allocation1 + $0x2] ss:$4 sm:$0xff] %v761_v5  ;;  %v682_v22 = vpack.c.bf16 %v664_v58, %v664_v58  ;;  %v663_v50 = vmax.f32 %v661_v46, 0.0 }
 0x25c   :  { %786 = vst [vmem:[#allocation1 + $0x3] ss:$4 sm:$0xff] %v764_v6 }
 0x25d   :  { %v798_v26 = vld.sshfl [vmem:[#allocation1 + $0x20] sm:$0xff pattern:$0x73625140]  ;;  %v799_v27 = vld.sshfl [vmem:[#allocation1 + $0x28] sm:$0xff pattern:$0x73625140]  ;;  %v1211_v51 = vunpack.c.l.b16 %v682_v22  ;;  %v681_v52 = vpack.c.bf16 %v663_v50, %v663_v50  ;;  %1196 = vmatpush.bf16.msrb.mxu2 %v2586_v54 }
 0x25e   :  { %v800_v32 = vld.sshfl [vmem:[#allocation1 + $0x30] sm:$0xff pattern:$0x73625140] }
 0x25f   :  { %v1212_v55 = vrot.slane %v1211_v51, 7  ;;  %v1210_v56 = vunpack.c.l.b16 %v681_v52  ;;  %v2594_v54 = vld [vmem:[#allocation10 + $0x30] sm:$0xff] }
 0x261   :  { %v1213_v59 = vsel %vm329_vm8, %v1212_v55, %v1210_v56  ;;  %1197 = vmatpush.bf16.msrb.mxu2 %v2585_v10 }
 0x262   :  { %v1214_v53 = vpack.c.b16 %v1213_v59, %v1213_v59 }
 0x263   :  { %v795_v28 = vld.sshfl [vmem:[#allocation1] sm:$0xff pattern:$0x73625140]  ;;  %v796_v57 = vld.sshfl [vmem:[#allocation1 + $0x8] sm:$0xff pattern:$0x73625140] }
 0x264   :  { %v797_v29 = vld.sshfl [vmem:[#allocation1 + $0x10] sm:$0xff pattern:$0x73625140]  ;;  %v815_v33 = vpack.c.bf16 %v798_v26, %v795_v28  ;;  %v816_v3 = vpack.c.bf16 %v799_v27, %v796_v57  ;;  %v2583_v26 = vld [vmem:[#allocation13 + $0x58] sm:$0xff] }
 0x265   :  { %801 = vst [vmem:[#allocation1] ss:$4 sm:$0xff] %v777_v18  ;;  %v817_v19 = vpack.c.bf16 %v800_v32, %v797_v29  ;;  %1198 = vmatpush.bf16.msrb.mxu2 %v2584_v15  ;;  %v2601_v15 = vld [vmem:[#allocation10 + $0x68] sm:$0xff] }
 0x266   :  { %802 = vst [vmem:[#allocation1 + $0x1] ss:$4 sm:$0xff] %v779_v8  ;;  %1021 = vmatmul.bf16.vlgmr.msra.gmra.mxu3 %v815_v33  ;;  %1039 = vmatmul.bf16.vlgmr.msrb.gmra.mxu0 %v816_v3  ;;  %v2582_v8 = vld [vmem:[#allocation13 + $0x50] sm:$0xff] }
 0x267   :  { %1057 = vmatmul.bf16.vlgmr.msrb.gmra.mxu1 %v817_v19  ;;  %1807 = vmatpush.bf16.msra.mxu3 %v2619_v0 }
 0x269   :  { %1199 = vmatpush.bf16.msrb.mxu2 %v2583_v26  ;;  %v2600_v26 = vld [vmem:[#allocation10 + $0x60] sm:$0xff] }
 0x26d   :  { %v803_v41 = vld.sshfl [vmem:[#allocation1] sm:$0xff pattern:$0x73625140]  ;;  %v804_v44 = vld.sshfl [vmem:[#allocation1 + $0x8] sm:$0xff pattern:$0x73625140]  ;;  %1200 = vmatpush.bf16.msrb.mxu2 %v2582_v8 }
 0x26e   :  { %v805_v45 = vld.sshfl [vmem:[#allocation1 + $0x10] sm:$0xff pattern:$0x73625140]  ;;  %v818_v47 = vpack.c.bf16 %v803_v41, %v803_v41  ;;  %v819_v48 = vpack.c.bf16 %v804_v44, %v804_v44 }
 0x26f   :  { %v820_v49 = vpack.c.bf16 %v805_v45, %v805_v45 }
 0x271   :  { %1201 = vmatpush.bf16.msrb.mxu2 %v2581_v39  ;;  %v2606_v39 = vld [vmem:[#allocation10 + $0x90] sm:$0xff] }
 0x276   :  { %1026 = vmatmul.bf16.gmra.mxu3 %v818_v47  ;;  %1044 = vmatmul.bf16.gmra.mxu0 %v819_v48  ;;  %v2580_v47 = vld [vmem:[#allocation13 + $0x40] sm:$0xff] }
 0x277   :  { %1062 = vmatmul.bf16.gmra.mxu1 %v820_v49  ;;  %1202 = vmatpush.bf16.msrb.mxu2 %v2580_v47  ;;  %v2589_v47 = vld [vmem:[#allocation10 + $0x8] sm:$0xff] }
 0x286   :  { %1272 = vmatmul.bf16.vlgmr.msrb.gmra.mxu3 %v1214_v53 }
 0x2e3   :  { %v1040_v60 = vpop.f32.mrf.mxu0 }
 0x2e4   :  { %v1058_v62 = vpop.f32.mrf.mxu1 }
 0x2e9   :  { %v1022_v63 = vpop.f32.mrf.mxu3 }
 0x2ea   :  { %v1041_v1 = vadd.f32 %v1040_v60, %v1022_v63  ;;  %v2595_v60 = vld [vmem:[#allocation10 + $0x38] sm:$0xff] }
 0x2eb   :  { %v1042_v16 = vpop.f32.mrf.mxu0  ;;  %v2611_v63 = vld [vmem:[#allocation10 + $0xb8] sm:$0xff]  ;;  %1753 = vmatpush.bf16.msra.mxu0 %v2595_v60 }
 0x2ec   :  { %v1059_v2 = vadd.f32 %v1058_v62, %v1041_v1  ;;  %v1060_v4 = vpop.f32.mrf.mxu1  ;;  %v2603_v62 = vld [vmem:[#allocation10 + $0x78] sm:$0xff]  ;;  %1789 = vmatpush.bf16.msra.mxu2 %v2611_v63  ;;  %v2588_v63 = vld [vmem:[#allocation10] sm:$0xff] }
 0x2ed   :  { %1771 = vmatpush.bf16.msra.mxu1 %v2603_v62  ;;  %v2613_v62 = vld [vmem:[#allocation10 + $0xc8] sm:$0xff] }
 0x2ee   :  { %v1070_v5 = vrot.slane %v1059_v2, 2  ;;  %v1071_v6 = vrot.slane %v1059_v2, 4  ;;  %v1072_v7 = vrot.slane %v1059_v2, 6  ;;  %1077 = vst [vmem:[#allocation1] ss:$4 sm:$0xff] %v1059_v2 }
 0x2ef   :  { %1754 = vmatpush.bf16.msra.mxu0 %v2594_v54  ;;  %v2612_v54 = vld [vmem:[#allocation10 + $0xc0] sm:$0xff] }
 0x2f0   :  { %1079 = vst [vmem:[#allocation1 + $0x1] ss:$4 sm:$0xff] %v1070_v5  ;;  %v2602_v5 = vld [vmem:[#allocation10 + $0x70] sm:$0xff] }
 0x2f1   :  { %1081 = vst [vmem:[#allocation1 + $0x2] ss:$4 sm:$0xff] %v1071_v6  ;;  %v1024_v9 = vpop.f32.mrf.mxu3  ;;  %v2610_v6 = vld [vmem:[#allocation10 + $0xb0] sm:$0xff]  ;;  %1772 = vmatpush.bf16.msra.mxu1 %v2602_v5 }
 0x2f2   :  { %1083 = vst [vmem:[#allocation1 + $0x3] ss:$4 sm:$0xff] %v1072_v7  ;;  %v1043_v61 = vadd.f32 %v1042_v16, %v1024_v9  ;;  %v2653_v16 = vld [vmem:[#allocation11 + $0x1] ss:$0 sm:$0xff]  ;;  %v2618_v9 = vld [vmem:[#allocation10 + $0xf0] sm:$0xff]  ;;  %1790 = vmatpush.bf16.msra.mxu2 %v2610_v6 }
 0x2f3   :  { %v1045_v11 = vpop.f32.mrf.mxu0  ;;  %1808 = vmatpush.bf16.msra.mxu3 %v2618_v9 }
 0x2f4   :  { %v1061_v12 = vadd.f32 %v1060_v4, %v1043_v61  ;;  %v1063_v13 = vpop.f32.mrf.mxu1 }
 0x2f5   :  { %1773 = vmatpush.bf16.msra.mxu1 %v2601_v15 }
 0x2f6   :  { %v1073_v14 = vrot.slane %v1061_v12, 2  ;;  %1085 = vst [vmem:[#allocation1 + $0x20] ss:$4 sm:$0xff] %v1061_v12  ;;  %v1074_v17 = vrot.slane %v1061_v12, 4  ;;  %v1075_v18 = vrot.slane %v1061_v12, 6 }
 0x2f9   :  { %v1086_v20 = vld.sshfl [vmem:[#allocation1] sm:$0xff pattern:$0x73625140]  ;;  %v1027_v21 = vpop.f32.mrf.mxu3  ;;  %1774 = vmatpush.bf16.msra.mxu1 %v2600_v26 }
 0x2fa   :  { %1088 = vst [vmem:[#allocation1] ss:$4 sm:$0xff] %v1073_v14  ;;  %v1046_v23 = vadd.f32 %v1045_v11, %v1027_v21  ;;  %v2593_v14 = vld [vmem:[#allocation10 + $0x28] sm:$0xff] }
 0x2fb   :  { %1089 = vst [vmem:[#allocation1 + $0x1] ss:$4 sm:$0xff] %v1074_v17  ;;  %v1047_v27 = vpop.f32.mrf.mxu0  ;;  %v2609_v17 = vld [vmem:[#allocation10 + $0xa8] sm:$0xff]  ;;  %1755 = vmatpush.bf16.msra.mxu0 %v2593_v14 }
 0x2fc   :  { %1090 = vst [vmem:[#allocation1 + $0x2] ss:$4 sm:$0xff] %v1075_v18  ;;  %v1064_v28 = vadd.f32 %v1063_v13, %v1046_v23  ;;  %v1065_v57 = vpop.f32.mrf.mxu1  ;;  %v2617_v21 = vld [vmem:[#allocation10 + $0xe8] sm:$0xff]  ;;  %v2592_v23 = vld [vmem:[#allocation10 + $0x20] sm:$0xff]  ;;  %1791 = vmatpush.bf16.msra.mxu2 %v2609_v17 }
 0x2fd   :  { %v1087_v25 = vld.sshfl [vmem:[#allocation1 + $0x20] sm:$0xff pattern:$0x73625140]  ;;  %1281 = vst [vmem:[#allocation1 + $0x10] ss:$2 sm:$0xff] %v3002_v34  ;;  %1809 = vmatpush.bf16.msra.mxu3 %v2617_v21 }
 0x2fe   :  { %v1076_v29 = vrot.slane %v1064_v28, 2  ;;  %1091 = vst [vmem:[#allocation1 + $0x3] ss:$4 sm:$0xff] %v1064_v28  ;;  %v1099_v32 = vsel %vm749_vm14, %v1087_v25, -inf  ;;  %v2608_v28 = vld [vmem:[#allocation10 + $0xa0] sm:$0xff] }
 0x2ff   :  { %v1100_v33 = vmax.f32 %v1086_v20, %v1099_v32  ;;  %v2616_v57 = vld [vmem:[#allocation10 + $0xe0] sm:$0xff]  ;;  %1756 = vmatpush.bf16.msra.mxu0 %v2592_v23  ;;  %v2599_v32 = vld [vmem:[#allocation10 + $0x58] sm:$0xff] }
 0x300   :  { %1092 = vst [vmem:[#allocation1 + $0x20] ss:$4 sm:$0xff] %v1076_v29  ;;  %v2591_v29 = vld [vmem:[#allocation10 + $0x18] sm:$0xff]  ;;  %1792 = vmatpush.bf16.msra.mxu2 %v2608_v28  ;;  %1775 = vmatpush.bf16.msra.mxu1 %v2599_v32 }
 0x301   :  { %1289 = vst [vmem:[#allocation1 + $0x30] ss:$2 sm:$0xff] %v3019_v43  ;;  %v1029_v3 = vpop.f32.mrf.mxu3  ;;  %v1101_v19 = vrot.slane %v1100_v33, 4  ;;  %1810 = vmatpush.bf16.msra.mxu3 %v2616_v57 }
 0x302   :  { %v2607_v3 = vld [vmem:[#allocation10 + $0x98] sm:$0xff] }
 0x303   :  { %v1102_v37 = vmax.f32 %v1100_v33, %v1101_v19  ;;  %1757 = vmatpush.bf16.msra.mxu0 %v2591_v29 }
 0x304   :  { %1793 = vmatpush.bf16.msra.mxu2 %v2607_v3 }
 0x305   :  { %v1093_v24 = vld.sshfl [vmem:[#allocation1] sm:$0xff pattern:$0x73625140]  ;;  %v3166_v36 = vld.sshfl [vmem:[#allocation1 + $0x10] sm:$0xff pattern:$0x75316420] }
 0x306   :  { %1277 = vst [vmem:[#allocation1] ss:$2 sm:$0xff] %v2995_v30  ;;  %v1103_v45 = vrot.slane %v1102_v37, 2 }
 0x307   :  { %v1094_v38 = vld.sshfl [vmem:[#allocation1 + $0x20] sm:$0xff pattern:$0x73625140]  ;;  %1279 = vst [vmem:[#allocation1 + $0x1] ss:$2 sm:$0xff] %v2998_v31 }
 0x308   :  { %1285 = vst [vmem:[#allocation1 + $0x20] ss:$2 sm:$0xff] %v3005_v35  ;;  %v3170_v40 = vld.sshfl [vmem:[#allocation1 + $0x30] sm:$0xff pattern:$0x75316420]  ;;  %v1107_v58 = vsel %vm749_vm14, %v1094_v38, -inf  ;;  %v1104_v22 = vmax.f32 %v1102_v37, %v1103_v45  ;;  %1794 = vmatpush.bf16.msra.mxu2 %v2606_v39 }
 0x309   :  { %1287 = vst [vmem:[#allocation1 + $0x21] ss:$2 sm:$0xff] %v3015_v42  ;;  %v3174_v41 = vpop.f32.mrf.mxu3  ;;  %v1108_v44 = vmax.f32 %v1093_v24, %v1107_v58  ;;  %v2590_v24 = vld [vmem:[#allocation10 + $0x10] sm:$0xff] }
 0x30a   :  { %1304 = vst [vmem:[#allocation1 + $0x30] ss:$2 sm:$0xff] %v3019_v43  ;;  %v1105_v53 = vrot.slane %v1104_v22, 1  ;;  %1758 = vmatpush.bf16.msra.mxu0 %v2590_v24 }
 0x30b   :  { %1296 = vst [vmem:[#allocation1 + $0x10] ss:$2 sm:$0xff] %v3002_v34  ;;  %v1109_v46 = vrot.slane %v1108_v44, 4 }
 0x30c   :  { %v1106_v2 = vmax.f32 %v1104_v22, %v1105_v53 }
 0x30d   :  { %v1110_v48 = vmax.f32 %v1108_v44, %v1109_v46  ;;  %v2614_v44 = vld [vmem:[#allocation10 + $0xd0] sm:$0xff] }
 0x30e   :  { %v3178_v49 = vld.sshfl [vmem:[#allocation1] sm:$0xff pattern:$0x75316420]  ;;  %v1117_v11 = vadd.f32 %v2653_v16, %v1106_v2  ;;  %1759 = vmatpush.bf16.msra.mxu0 %v2589_v47 }
 0x30f   :  { %1294 = vst [vmem:[#allocation1 + $0x1] ss:$2 sm:$0xff] %v2998_v31  ;;  %v1111_v50 = vrot.slane %v1110_v48, 2 }
 0x310   :  { %v3181_v51 = vld.sshfl [vmem:[#allocation1 + $0x20] sm:$0xff pattern:$0x75316420]  ;;  %1292 = vst [vmem:[#allocation1] ss:$2 sm:$0xff] %v2995_v30  ;;  %v1119_v18 = vmax.f32 %v1117_v11, 0.0 }
 0x311   :  { %1300 = vst [vmem:[#allocation1 + $0x20] ss:$2 sm:$0xff] %v3005_v35  ;;  %v3185_v52 = vld.sshfl [vmem:[#allocation1 + $0x30] sm:$0xff pattern:$0x75316420]  ;;  %v1275_v55 = vpop.f32.mrf.mxu3  ;;  %v1112_v56 = vmax.f32 %v1110_v48, %v1111_v50 }
 0x312   :  { %1302 = vst [vmem:[#allocation1 + $0x21] ss:$2 sm:$0xff] %v3015_v42  ;;  %v3188_v59 = vld.sshfl [vmem:[#allocation1 + $0x10] sm:$0xff pattern:$0x75316420]  ;;  %1760 = vmatpush.bf16.msra.mxu0 %v2588_v63 }
 0x313   :  { %1325 = vst [vmem:[#allocation1 + $0x30] ss:$2 sm:$0xff] %v3019_v43  ;;  %v1113_v1 = vrot.slane %v1112_v56, 1  ;;  %v1308_v45 = vrot.slane %v3188_v59, 1  ;;  %v2597_v50 = vld [vmem:[#allocation10 + $0x48] sm:$0xff] }
 0x314   :  { %1317 = vst [vmem:[#allocation1 + $0x10] ss:$2 sm:$0xff] %v3002_v34 }
 0x315   :  { %v1114_v4 = vmax.f32 %v1112_v56, %v1113_v1  ;;  %v2605_v56 = vld [vmem:[#allocation10 + $0x88] sm:$0xff] }
 0x316   :  { %1795 = vmatpush.bf16.msra.mxu2 %v2605_v56 }
 0x317   :  { %v3192_v7 = vld.sshfl [vmem:[#allocation1] sm:$0xff pattern:$0x75316420]  ;;  %v1118_v12 = vadd.f32 %v2653_v16, %v1114_v4 }
 0x318   :  { %1313 = vst [vmem:[#allocation1] ss:$2 sm:$0xff] %v2995_v30  ;;  %v1307_v37 = vrot.slane %v3192_v7, 1  ;;  %v2596_v16 = vld [vmem:[#allocation10 + $0x40] sm:$0xff] }
 0x319   :  { %v3195_v61 = vld.sshfl [vmem:[#allocation1 + $0x20] sm:$0xff pattern:$0x75316420]  ;;  %1315 = vst [vmem:[#allocation1 + $0x1] ss:$2 sm:$0xff] %v2998_v31  ;;  %v1120_v20 = vmax.f32 %v1118_v12, 0.0 }
 0x31a   :  { %1321 = vst [vmem:[#allocation1 + $0x20] ss:$2 sm:$0xff] %v3005_v35  ;;  %v3199_v10 = vld.sshfl [vmem:[#allocation1 + $0x30] sm:$0xff pattern:$0x75316420]  ;;  %v1309_v55 = vsel %vm317_vm6, %v1307_v37, %v1308_v45  ;;  %v2604_v4 = vld [vmem:[#allocation10 + $0x80] sm:$0xff] }
 0x31b   :  { %1323 = vst [vmem:[#allocation1 + $0x21] ss:$2 sm:$0xff] %v3015_v42  ;;  %v3202_v13 = vld.sshfl [vmem:[#allocation1 + $0x10] sm:$0xff pattern:$0x75316420]  ;;  %v1138_v25 = vpack.c.bf16 %v1120_v20, %v1120_v20  ;;  %v1356_v0 = vrot.slane %v1309_v55, 7  ;;  %1796 = vmatpush.bf16.msra.mxu2 %v2604_v4 }
 0x31c   :  { %1346 = vst [vmem:[#allocation1 + $0x30] ss:$2 sm:$0xff] %v3019_v43  ;;  %v1329_v53 = vrot.slane %v3202_v13, 2 }
 0x31d   :  { %1338 = vst [vmem:[#allocation1 + $0x10] ss:$2 sm:$0xff] %v3002_v34  ;;  %v1137_v34 = vpack.c.bf16 %v1119_v18, %v1119_v18  ;;  %v1142_v33 = vunpack.c.l.b16 %v1138_v25  ;;  %v1368_v6 = vsel %vm259_vm0, %v3178_v49, %v1356_v0  ;;  %v1371_v7 = vsel %vm329_vm8, %v3178_v49, %v1356_v0 }
 0x31e   :  { %v1376_v9 = vsel %vm332_vm7, %v3178_v49, %v1356_v0  ;;  %v1380_v18 = vsel %vm335_vm9, %v3178_v49, %v1356_v0  ;;  %v1385_v20 = vsel %vm338_vm10, %v3178_v49, %v1356_v0  ;;  %v1389_v26 = vsel %vm341_vm11, %v3178_v49, %v1356_v0 }
 0x31f   :  { %v1141_v8 = vunpack.c.l.b16 %v1137_v34  ;;  %v1143_v19 = vrot.slane %v1142_v33, 7 }
 0x320   :  { %v1318_v27 = vld.sshfl [vmem:[#allocation1] sm:$0xff pattern:$0x75316420] }
 0x321   :  { %1334 = vst [vmem:[#allocation1] ss:$2 sm:$0xff] %v2995_v30  ;;  %v2615_v30 = vld [vmem:[#allocation10 + $0xd8] sm:$0xff]  ;;  %v1328_v48 = vrot.slane %v1318_v27, 2  ;;  %v1394_v27 = vsel %vm344_vm12, %v3178_v49, %v1356_v0 }
 0x322   :  { %v3207_v43 = vld.sshfl [vmem:[#allocation1 + $0x20] sm:$0xff pattern:$0x75316420]  ;;  %1336 = vst [vmem:[#allocation1 + $0x1] ss:$2 sm:$0xff] %v2998_v31  ;;  %v2598_v31 = vld [vmem:[#allocation10 + $0x50] sm:$0xff]  ;;  %1811 = vmatpush.bf16.msra.mxu3 %v2615_v30  ;;  %v1398_v30 = vsel %vm317_vm6, %v1356_v0, %v3178_v49 }
 0x323   :  { %1342 = vst [vmem:[#allocation1 + $0x20] ss:$2 sm:$0xff] %v3005_v35  ;;  %v1144_v35 = vsel %vm329_vm8, %v1143_v19, %v1141_v8  ;;  %1776 = vmatpush.bf16.msra.mxu1 %v2598_v31  ;;  %v1330_v1 = vsel %vm734_vm1, %v1328_v48, %v1329_v53  ;;  %v3250_v34 = vld.sshfl [vmem:[#allocation1 + $0x30] sm:$0xff pattern:$0x75316420]  ;;  %v1311_v48 = vrot.slane %v3185_v52, 1 }
 0x324   :  { %1344 = vst [vmem:[#allocation1 + $0x21] ss:$2 sm:$0xff] %v3015_v42  ;;  %v3213_v38 = vld.sshfl [vmem:[#allocation1 + $0x10] sm:$0xff pattern:$0x75316420]  ;;  %v1145_v58 = vpack.c.b16 %v1144_v35, %v1144_v35  ;;  %v1357_v5 = vrot.slane %v1330_v1, 6 }
 0x325   :  { %v1351_v22 = vrot.slane %v3213_v38, 3 }
 0x326   :  { %1203 = vmatmul.bf16.vlgmr.msrb.gmra.mxu2 %v1145_v58  ;;  %1812 = vmatpush.bf16.msra.mxu3 %v2614_v44  ;;  %v1310_v58 = vrot.slane %v3195_v61, 1  ;;  %v1331_v44 = vrot.slane %v3207_v43, 2 }
 0x327   :  { %1777 = vmatpush.bf16.msra.mxu1 %v2597_v50  ;;  %v1332_v50 = vrot.slane %v3199_v10, 2  ;;  %v1359_v10 = vrot.slane %v1308_v45, 7  ;;  %v1361_v0 = vrot.slane %v1351_v22, 5 }
 0x328   :  { %v1312_v61 = vsel %vm317_vm6, %v1310_v58, %v1311_v48 }
 0x329   :  { %v1339_v42 = vld.sshfl [vmem:[#allocation1] sm:$0xff pattern:$0x75316420]  ;;  %v1333_v43 = vsel %vm734_vm1, %v1331_v44, %v1332_v50 }
 0x32a   :  { %v1350_v46 = vrot.slane %v1339_v42, 3  ;;  %1813 = vmatpush.bf16.msra.mxu3 %v2613_v62  ;;  %v1362_v62 = vrot.slane %v1312_v61, 7  ;;  %v1363_v63 = vrot.slane %v1333_v43, 6 }
 0x32b   :  { %1778 = vmatpush.bf16.msra.mxu1 %v2596_v16  ;;  %v1347_v17 = vld.sshfl [vmem:[#allocation1 + $0x20] sm:$0xff pattern:$0x75316420]  ;;  %v1360_v16 = vrot.slane %v1329_v53, 6 }
 0x32c   :  { %v1352_v60 = vsel %vm3351_vm5, %v1350_v46, %v1351_v22  ;;  %vm1400_vm5 = vcmask 1046529   ;;  %v1353_v3 = vrot.slane %v1347_v17, 3  ;;  %v1354_v46 = vrot.slane %v3250_v34, 3 }
 0x32d   :  { %v1358_v2 = vrot.slane %v1352_v60, 5  ;;  %v1409_v4 = vsel %vm329_vm8, %v3181_v51, %v1362_v62  ;;  %v1404_v59 = vsel %vm332_vm7, %v1360_v16, %v1361_v0  ;;  %v1413_v38 = vsel %vm332_vm7, %v3181_v51, %v1362_v62 }
 0x32e   :  { %1814 = vmatpush.bf16.msra.mxu3 %v2612_v54  ;;  %v1403_v54 = vsel %vm259_vm0, %v3166_v36, %v1359_v10  ;;  %v1406_v53 = vsel %vm259_vm0, %v3181_v51, %v1362_v62 }
 0x32f   :  { %v1369_v11 = vsel %vm332_vm7, %v1357_v5, %v1358_v2  ;;  %v1372_v12 = vsel %vm335_vm9, %v1357_v5, %v1358_v2  ;;  %v1377_v14 = vsel %vm338_vm10, %v1357_v5, %v1358_v2  ;;  %v1381_v15 = vsel %vm341_vm11, %v1357_v5, %v1358_v2 }
 0x330   :  { %v1386_v21 = vsel %vm344_vm12, %v1357_v5, %v1358_v2  ;;  %v1390_v23 = vsel %vm317_vm6, %v1358_v2, %v1357_v5  ;;  %v1395_v28 = vsel %vm259_vm0, %v1357_v5, %v1358_v2  ;;  %v1399_v57 = vsel %vm329_vm8, %v1357_v5, %v1358_v2 }
 0x331   :  { %v1370_v25 = vsel %vm749_vm14, %v1368_v6, %v1369_v11  ;;  %v1374_v29 = vsel %vm1373_vm13, %v1371_v7, %v1372_v12  ;;  %v1378_v32 = vsel %vm753_vm2, %v1376_v9, %v1377_v14  ;;  %v1383_v33 = vsel %vm1382_vm15, %v1380_v18, %v1381_v15 }
 0x332   :  { %v1387_v8 = vsel %vm758_vm3, %v1385_v20, %v1386_v21  ;;  %v1392_v19 = vsel %vm3352_vm4, %v1389_v26, %v1390_v23  ;;  %1440 = vst [vmem:[#allocation1] ss:$9 sm:$0xff] %v1370_v25  ;;  %v1396_v24 = vsel %vm734_vm1, %v1395_v28, %v1394_v27  ;;  %v1375_v31 = vrot.slane %v1374_v29, 1 }
 0x333   :  { %v1379_v37 = vrot.slane %v1378_v32, 2  ;;  %v1384_v35 = vrot.slane %v1383_v33, 3  ;;  %v1401_v39 = vsel %vm1400_vm5, %v1399_v57, %v1398_v30  ;;  %v1388_v42 = vrot.slane %v1387_v8, 4 }
 0x334   :  { %v1393_v49 = vrot.slane %v1392_v19, 5  ;;  %1442 = vst [vmem:[#allocation1 + $0x1] ss:$9 sm:$0xff] %v1375_v31  ;;  %v1397_v47 = vrot.slane %v1396_v24, 6  ;;  %vm3353_vm4 = vcmask 1044480   ;;  %v1402_v56 = vrot.slane %v1401_v39, 7 }
 0x335   :  { %1444 = vst [vmem:[#allocation1 + $0x2] ss:$9 sm:$0xff] %v1379_v37  ;;  %v1355_v55 = vsel %vm3353_vm4, %v1353_v3, %v1354_v46  ;;  %v1417_v6 = vsel %vm335_vm9, %v3181_v51, %v1362_v62  ;;  %v1421_v14 = vsel %vm338_vm10, %v3181_v51, %v1362_v62  ;;  %v1405_v18 = vsel %vm749_vm14, %v1403_v54, %v1404_v59  ;;  %v2625_v54 = vld [vmem:[#allocation13 + $0xa8] sm:$0xff] }
 0x336   :  { %1446 = vst [vmem:[#allocation1 + $0x3] ss:$9 sm:$0xff] %v1384_v35  ;;  %v1364_v60 = vrot.slane %v1355_v55, 5  ;;  %v1425_v21 = vsel %vm341_vm11, %v3181_v51, %v1362_v62  ;;  %v1429_v28 = vsel %vm344_vm12, %v3181_v51, %v1362_v62  ;;  %v1367_v19 = vrot.slane %v1354_v46, 5 }
 0x337   :  { %1448 = vst [vmem:[#allocation1 + $0x4] ss:$9 sm:$0xff] %v1388_v42  ;;  %v1433_v24 = vsel %vm317_vm6, %v1362_v62, %v3181_v51  ;;  %v1365_v31 = vrot.slane %v1311_v48, 7  ;;  %v1366_v37 = vrot.slane %v1332_v50, 6 }
 0x338   :  { %1450 = vst [vmem:[#allocation1 + $0x5] ss:$9 sm:$0xff] %v1393_v49  ;;  %v1410_v1 = vsel %vm335_vm9, %v1363_v63, %v1364_v60  ;;  %v1414_v2 = vsel %vm338_vm10, %v1363_v63, %v1364_v60  ;;  %v1418_v5 = vsel %vm341_vm11, %v1363_v63, %v1364_v60  ;;  %v1407_v45 = vsel %vm332_vm7, %v1363_v63, %v1364_v60 }
 0x339   :  { %1452 = vst [vmem:[#allocation1 + $0x6] ss:$9 sm:$0xff] %v1397_v47  ;;  %v1422_v13 = vsel %vm344_vm12, %v1363_v63, %v1364_v60  ;;  %v1411_v22 = vsel %vm1373_vm13, %v1409_v4, %v1410_v1  ;;  %v1426_v36 = vsel %vm317_vm6, %v1364_v60, %v1363_v63  ;;  %v1415_v7 = vsel %vm753_vm2, %v1413_v38, %v1414_v2  ;;  %v2627_v1 = vld [vmem:[#allocation13 + $0xb8] sm:$0xff]  ;;  %v2626_v4 = vld [vmem:[#allocation13 + $0xb0] sm:$0xff] }
 0x33a   :  { %1454 = vst [vmem:[#allocation1 + $0x7] ss:$9 sm:$0xff] %v1402_v56  ;;  %v1430_v15 = vsel %vm259_vm0, %v1363_v63, %v1364_v60  ;;  %v1419_v17 = vsel %vm1382_vm15, %v1417_v6, %v1418_v5  ;;  %v1408_v23 = vsel %vm749_vm14, %v1406_v53, %v1407_v45  ;;  %v1423_v26 = vsel %vm758_vm3, %v1421_v14, %v1422_v13  ;;  %v2624_v53 = vld [vmem:[#allocation13 + $0xa0] sm:$0xff] }
 0x33b   :  { %v1412_v27 = vrot.slane %v1411_v22, 1  ;;  %vm3354_vm9 = vcmask 1046533   ;;  %v1416_v25 = vrot.slane %v1415_v7, 2  ;;  %v1431_v29 = vsel %vm734_vm1, %v1430_v15, %v1429_v28  ;;  %1972 = vmatpush.bf16.msrb.mxu0 %v2627_v1  ;;  %v2621_v28 = vld [vmem:[#allocation13 + $0x88] sm:$0xff] }
 0x33c   :  { %v1427_v57 = vsel %vm3354_vm9, %v1425_v21, %v1426_v36  ;;  %v1420_v32 = vrot.slane %v1419_v17, 3  ;;  %v1424_v33 = vrot.slane %v1423_v26, 4  ;;  %v1432_v30 = vrot.slane %v1431_v29, 6  ;;  %v2622_v26 = vld [vmem:[#allocation13 + $0x90] sm:$0xff]  ;;  %v2633_v1 = vld [vmem:[#allocation14 + $0x28] sm:$0xff] }
 0x33d   :  { %v1428_v3 = vrot.slane %v1427_v57, 5  ;;  %v1434_v8 = vsel %vm329_vm8, %v1363_v63, %v1364_v60  ;;  %v1438_v39 = vsel %vm332_vm7, %v1366_v37, %v1367_v19  ;;  %v1437_v47 = vsel %vm259_vm0, %v3170_v40, %v1365_v31 }
 0x33e   :  { %v1435_v35 = vsel %vm1400_vm5, %v1434_v8, %v1433_v24  ;;  %v1439_v51 = vsel %vm749_vm14, %v1437_v47, %v1438_v39 }
 0x33f   :  { %v1436_v42 = vrot.slane %v1435_v35, 7  ;;  %1973 = vmatpush.bf16.msrb.mxu0 %v2626_v4 }
 0x341   :  { %v1455_v9 = vld [vmem:[#allocation1] sm:$0xff]  ;;  %v1456_v11 = vld [vmem:[#allocation1 + $0x9] sm:$0xff]  ;;  %v1457_v12 = vld [vmem:[#allocation1 + $0x12] sm:$0xff] }
 0x342   :  { %v1458_v20 = vld [vmem:[#allocation1 + $0x1b] sm:$0xff] }
 0x343   :  { %1459 = vst [vmem:[#allocation1] ss:$9 sm:$0xff] %v1405_v18  ;;  %1974 = vmatpush.bf16.msrb.mxu0 %v2625_v54  ;;  %v2632_v54 = vld [vmem:[#allocation14 + $0x20] sm:$0xff] }
 0x344   :  { %1460 = vst [vmem:[#allocation1 + $0x1] ss:$9 sm:$0xff] %v1408_v23 }
 0x345   :  { %1461 = vst [vmem:[#allocation1 + $0x2] ss:$9 sm:$0xff] %v1412_v27 }
 0x346   :  { %1462 = vst [vmem:[#allocation1 + $0x3] ss:$9 sm:$0xff] %v1416_v25 }
 0x347   :  { %1463 = vst [vmem:[#allocation1 + $0x4] ss:$9 sm:$0xff] %v1420_v32  ;;  %1975 = vmatpush.bf16.msrb.mxu0 %v2624_v53 }
 0x348   :  { %1464 = vst [vmem:[#allocation1 + $0x5] ss:$9 sm:$0xff] %v1424_v33 }
 0x349   :  { %1465 = vst [vmem:[#allocation1 + $0x6] ss:$9 sm:$0xff] %v1428_v3  ;;  %v2620_v3 = vld [vmem:[#allocation13 + $0x80] sm:$0xff] }
 0x34a   :  { %1466 = vst [vmem:[#allocation1 + $0x7] ss:$9 sm:$0xff] %v1432_v30 }
 0x351   :  { %v1467_v58 = vld [vmem:[#allocation1] sm:$0xff]  ;;  %v1468_v44 = vld [vmem:[#allocation1 + $0x9] sm:$0xff]  ;;  %v1469_v49 = vld [vmem:[#allocation1 + $0x12] sm:$0xff] }
 0x352   :  { %v1489_v34 = vpack.c.bf16 %v1467_v58, %v1455_v9  ;;  %v1490_v46 = vpack.c.bf16 %v1468_v44, %v1456_v11  ;;  %v1491_v55 = vpack.c.bf16 %v1469_v49, %v1457_v12  ;;  %v1470_v56 = vld [vmem:[#allocation1 + $0x1b] sm:$0xff] }
 0x353   :  { %v1492_v52 = vpack.c.bf16 %v1470_v56, %v1458_v20  ;;  %1471 = vst [vmem:[#allocation1] ss:$9 sm:$0xff] %v1436_v42  ;;  %v2623_v12 = vld [vmem:[#allocation13 + $0x98] sm:$0xff] }
 0x354   :  { %1761 = vmatmul.bf16.vlgmr.msra.gmra.mxu0 %v1489_v34  ;;  %1779 = vmatmul.bf16.vlgmr.msra.gmra.mxu1 %v1490_v46  ;;  %1472 = vst [vmem:[#allocation1 + $0x1] ss:$9 sm:$0xff] %v1439_v51 }
 0x355   :  { %1797 = vmatmul.bf16.vlgmr.msra.gmra.mxu2 %v1491_v55  ;;  %1815 = vmatmul.bf16.vlgmr.msra.gmra.mxu3 %v1492_v52 }
 0x356   :  { %1976 = vmatpush.bf16.msrb.mxu0 %v2623_v12  ;;  %v2629_v12 = vld [vmem:[#allocation14 + $0x8] sm:$0xff] }
 0x35a   :  { %1977 = vmatpush.bf16.msrb.mxu0 %v2622_v26  ;;  %v2628_v26 = vld [vmem:[#allocation14] sm:$0xff] }
 0x35b   :  { %v1473_v48 = vld [vmem:[#allocation1] sm:$0xff]  ;;  %v1474_v50 = vld [vmem:[#allocation1 + $0x9] sm:$0xff]  ;;  %v1475_v61 = vld [vmem:[#allocation1 + $0x12] sm:$0xff] }
 0x35c   :  { %v1476_v43 = vld [vmem:[#allocation1 + $0x1b] sm:$0xff]  ;;  %v1493_v60 = vpack.c.bf16 %v1473_v48, %v1473_v48  ;;  %v1494_v62 = vpack.c.bf16 %v1474_v50, %v1474_v50  ;;  %v1495_v40 = vpack.c.bf16 %v1475_v61, %v1475_v61 }
 0x35d   :  { %v1496_v63 = vpack.c.bf16 %v1476_v43, %v1476_v43  ;;  %v2635_v43 = vld [vmem:[#allocation14 + $0x38] sm:$0xff] }
 0x35e   :  { %1978 = vmatpush.bf16.msrb.mxu0 %v2621_v28  ;;  %2060 = vmatpush.bf16.msrb.mxu1 %v2635_v43  ;;  %v2655_v28 = vld [vmem:[%s3347_s7] ss:$0 sm:$0xff] }
 0x362   :  { %1979 = vmatpush.bf16.msrb.mxu0 %v2620_v3  ;;  %v2656_v3 = vld [vmem:[%s3349_s9] ss:$0 sm:$0xff] }
 0x364   :  { %1766 = vmatmul.bf16.gmra.mxu0 %v1493_v60  ;;  %1784 = vmatmul.bf16.gmra.mxu1 %v1494_v62  ;;  %v2634_v60 = vld [vmem:[#allocation14 + $0x30] sm:$0xff] }
 0x365   :  { %1802 = vmatmul.bf16.gmra.mxu2 %v1495_v40  ;;  %1820 = vmatmul.bf16.gmra.mxu3 %v1496_v63 }
 0x366   :  { %2061 = vmatpush.bf16.msrb.mxu1 %v2634_v60 }
 0x36a   :  { %2062 = vmatpush.bf16.msrb.mxu1 %v2633_v1 }
 0x36e   :  { %2063 = vmatpush.bf16.msrb.mxu1 %v2632_v54 }
 0x3a9   :  { %v3324_v10 = vpop.f32.mrf.mxu2 }
 0x3b1   :  { %v1206_v0 = vpop.f32.mrf.mxu2 }
 0x3d1   :  { %v1762_v16 = vpop.f32.mrf.mxu0  ;;  %v1780_v2 = vpop.f32.mrf.mxu1 }
 0x3d2   :  { %v1781_v5 = vadd.f32 %v1780_v2, %v1762_v16 }
 0x3d8   :  { %v1798_v59 = vpop.f32.mrf.mxu2  ;;  %v1816_v38 = vpop.f32.mrf.mxu3 }
 0x3d9   :  { %v1799_v45 = vadd.f32 %v1798_v59, %v1781_v5  ;;  %v1764_v13 = vpop.f32.mrf.mxu0  ;;  %v1782_v22 = vpop.f32.mrf.mxu1 }
 0x3da   :  { %v1783_v27 = vadd.f32 %v1782_v22, %v1764_v13  ;;  %v2631_v13 = vld [vmem:[#allocation14 + $0x18] sm:$0xff] }
 0x3db   :  { %v1817_v6 = vadd.f32 %v1816_v38, %v1799_v45  ;;  %v2654_v38 = vld [vmem:[#allocation11 + $0x2] ss:$0 sm:$0xff]  ;;  %2064 = vmatpush.bf16.msrb.mxu1 %v2631_v13 }
 0x3dd   :  { %v1828_v36 = vrot.slane %v1817_v6, 1  ;;  %v1829_v7 = vrot.slane %v1817_v6, 2  ;;  %v1830_v9 = vrot.slane %v1817_v6, 3  ;;  %1843 = vst [vmem:[#allocation1] ss:$9 sm:$0xff] %v1817_v6  ;;  %v1831_v11 = vrot.slane %v1817_v6, 4 }
 0x3de   :  { %v1832_v14 = vrot.slane %v1817_v6, 5  ;;  %v1833_v15 = vrot.slane %v1817_v6, 6  ;;  %v1834_v20 = vrot.slane %v1817_v6, 7 }
 0x3df   :  { %1845 = vst [vmem:[#allocation1 + $0x1] ss:$9 sm:$0xff] %v1828_v36  ;;  %v2630_v36 = vld [vmem:[#allocation14 + $0x10] sm:$0xff] }
 0x3e0   :  { %1847 = vst [vmem:[#allocation1 + $0x2] ss:$9 sm:$0xff] %v1829_v7  ;;  %v1800_v17 = vpop.f32.mrf.mxu2  ;;  %v1818_v18 = vpop.f32.mrf.mxu3  ;;  %2065 = vmatpush.bf16.msrb.mxu1 %v2630_v36 }
 0x3e1   :  { %1849 = vst [vmem:[#allocation1 + $0x3] ss:$9 sm:$0xff] %v1830_v9  ;;  %v1767_v21 = vpop.f32.mrf.mxu0  ;;  %v1785_v23 = vpop.f32.mrf.mxu1  ;;  %v1801_v57 = vadd.f32 %v1800_v17, %v1783_v27  ;;  %v1274_v27 = vadd.f32 %v3174_v41, %v3324_v10 }
 0x3e2   :  { %1851 = vst [vmem:[#allocation1 + $0x4] ss:$9 sm:$0xff] %v1831_v11  ;;  %v1786_v35 = vadd.f32 %v1785_v23, %v1767_v21 }
 0x3e3   :  { %1853 = vst [vmem:[#allocation1 + $0x5] ss:$9 sm:$0xff] %v1832_v14  ;;  %v1819_v30 = vadd.f32 %v1818_v18, %v1801_v57 }
 0x3e4   :  { %1855 = vst [vmem:[#allocation1 + $0x6] ss:$9 sm:$0xff] %v1833_v15  ;;  %2066 = vmatpush.bf16.msrb.mxu1 %v2629_v12 }
 0x3e5   :  { %1857 = vst [vmem:[#allocation1 + $0x7] ss:$9 sm:$0xff] %v1834_v20  ;;  %v1835_v31 = vrot.slane %v1819_v30, 1  ;;  %v1836_v37 = vrot.slane %v1819_v30, 2  ;;  %v1837_v42 = vrot.slane %v1819_v30, 3  ;;  %v1838_v58 = vrot.slane %v1819_v30, 4 }
 0x3e6   :  { %v1839_v49 = vrot.slane %v1819_v30, 5  ;;  %v1840_v47 = vrot.slane %v1819_v30, 6  ;;  %v1841_v46 = vrot.slane %v1819_v30, 7 }
 0x3e8   :  { %v1803_v25 = vpop.f32.mrf.mxu2  ;;  %v1821_v29 = vpop.f32.mrf.mxu3  ;;  %2067 = vmatpush.bf16.msrb.mxu1 %v2628_v26 }
 0x3e9   :  { %v1769_v32 = vpop.f32.mrf.mxu0  ;;  %v1787_v33 = vpop.f32.mrf.mxu1  ;;  %v1804_v44 = vadd.f32 %v1803_v25, %v1786_v35 }
 0x3eb   :  { %v1822_v55 = vadd.f32 %v1821_v29, %v1804_v44 }
 0x3ec   :  { %v1858_v8 = vld [vmem:[#allocation1] sm:$0xff] }
 0x3ed   :  { %1859 = vst [vmem:[#allocation1] ss:$9 sm:$0xff] %v1819_v30  ;;  %v1842_v52 = vrot.slane %v1822_v55, 1 }
 0x3f0   :  { %v1805_v19 = vpop.f32.mrf.mxu2  ;;  %v1823_v24 = vpop.f32.mrf.mxu3 }
 0x3f4   :  { %v1860_v39 = vld [vmem:[#allocation1] sm:$0xff] }
 0x3f5   :  { %1861 = vst [vmem:[#allocation1] ss:$9 sm:$0xff] %v1835_v31  ;;  %v1876_v34 = vsel %vm259_vm0, %v1860_v39, -inf }
 0x3f6   :  { %1862 = vst [vmem:[#allocation1 + $0x1] ss:$9 sm:$0xff] %v1836_v37  ;;  %v1877_v56 = vmax.f32 %v1858_v8, %v1876_v34 }
 0x3f7   :  { %1863 = vst [vmem:[#allocation1 + $0x2] ss:$9 sm:$0xff] %v1837_v42 }
 0x3f8   :  { %1864 = vst [vmem:[#allocation1 + $0x3] ss:$9 sm:$0xff] %v1838_v58  ;;  %v1878_v51 = vrot.slane %v1877_v56, 4 }
 0x3f9   :  { %1865 = vst [vmem:[#allocation1 + $0x4] ss:$9 sm:$0xff] %v1839_v49 }
 0x3fa   :  { %1866 = vst [vmem:[#allocation1 + $0x5] ss:$9 sm:$0xff] %v1840_v47  ;;  %v1879_v50 = vmax.f32 %v1877_v56, %v1878_v51 }
 0x3fb   :  { %1867 = vst [vmem:[#allocation1 + $0x6] ss:$9 sm:$0xff] %v1841_v46 }
 0x3fc   :  { %1868 = vst [vmem:[#allocation1 + $0x7] ss:$9 sm:$0xff] %v1822_v55  ;;  %v1880_v61 = vrot.slane %v1879_v50, 2 }
 0x3fe   :  { %v1881_v40 = vmax.f32 %v1879_v50, %v1880_v61 }
 0x400   :  { %v1882_v16 = vrot.slane %v1881_v40, 1 }
 0x402   :  { %v1883_v5 = vmax.f32 %v1881_v40, %v1882_v16 }
 0x403   :  { %v1869_v48 = vld [vmem:[#allocation1] sm:$0xff] }
 0x404   :  { %1870 = vst [vmem:[#allocation1] ss:$9 sm:$0xff] %v1842_v52  ;;  %v1894_v53 = vadd.f32 %v2654_v38, %v1883_v5 }
 0x406   :  { %v1896_v9 = vmax.f32 %v1894_v53, 0.0 }
 0x408   :  { %v1914_v14 = vpack.c.bf16 %v1896_v9, %v1896_v9 }
 0x40a   :  { %v1918_v18 = vunpack.c.l.b16 %v1914_v14 }
 0x40b   :  { %v1871_v62 = vld [vmem:[#allocation1] sm:$0xff] }
 0x40c   :  { %v1884_v63 = vsel %vm259_vm0, %v1871_v62, -inf }
 0x40d   :  { %v1885_v0 = vmax.f32 %v1869_v48, %v1884_v63 }
 0x40f   :  { %v1886_v2 = vrot.slane %v1885_v0, 4 }
 0x411   :  { %v1887_v4 = vmax.f32 %v1885_v0, %v1886_v2 }
 0x413   :  { %v1888_v59 = vrot.slane %v1887_v4, 2 }
 0x415   :  { %v1889_v45 = vmax.f32 %v1887_v4, %v1888_v59 }
 0x417   :  { %v1890_v22 = vrot.slane %v1889_v45, 1 }
 0x419   :  { %v1891_v6 = vmax.f32 %v1889_v45, %v1890_v22 }
 0x41b   :  { %v1895_v7 = vadd.f32 %v2654_v38, %v1891_v6 }
 0x41d   :  { %v1897_v11 = vmax.f32 %v1895_v7, 0.0 }
 0x41f   :  { %v1915_v15 = vpack.c.bf16 %v1897_v11, %v1897_v11 }
 0x421   :  { %v1919_v17 = vunpack.c.l.b16 %v1915_v15 }
 0x423   :  { %v1920_v20 = vrot.slane %v1919_v17, 7 }
 0x425   :  { %v1921_v21 = vsel %vm329_vm8, %v1920_v20, %v1918_v18 }
 0x426   :  { %v1922_v23 = vpack.c.b16 %v1921_v21, %v1921_v21 }
 0x428   :  { %1980 = vmatmul.bf16.vlgmr.msrb.gmra.mxu0 %v1922_v23 }
 0x4a5   :  { %v1981_v57 = vpop.f32.mrf.mxu0 }
 0x4a6   :  { %v1985_v25 = vadd.f32 %v1981_v57, %v1274_v27 }
 0x4a8   :  { %v1990_v29 = vadd.f32 %v2655_v28, %v1985_v25 }
 0x4aa   :  { %v1991_v32 = vpack.c.bf16 %v1990_v29, %v1990_v29 }
 0x4ac   :  { %2068 = vmatmul.bf16.vlgmr.msrb.gmra.mxu1 %v1991_v32 }
 0x4ad   :  { %v1983_v33 = vpop.f32.mrf.mxu0 }
 0x529   :  { %v2069_v41 = vpop.f32.mrf.mxu1 }
 0x52a   :  { %v2070_v10 = vadd.f32 %v2656_v3, %v2069_v41 }
 0x52c   :  { %2073 = vst [vmem:[#allocation16] sm:$0x3] %v2070_v10 }
 0x52d   :  { %2084 = dma.vmem_to_hbm [thread:$0]  %s2080_s30, 32, %s2082_s13, [#allocation4]  }
 0x531   :  { %v2071_v30 = vpop.f32.mrf.mxu1 }
 0x532   :  { %2883 = dma.done.wait [#allocation4], 32  }
 0x533   :  { %2884 = vsyncadd [#allocation4], 4294967264 }
 0x534   :  { %2089 = vsyncpa [#allocation3], 1 }
 0x535   :  { %2090 = vsyncpa [#allocation6], 1 }
 0x536   :  { %2091 = vsyncpa [#allocation9], 1 }
 0x537   :  { %2092 = vsyncpa [#allocation12], 1 }
 0x538   :  { %2093 = vsyncpa [#allocation15], 1 }
 0x539   :  { %2094 = vsyncpa [#allocation4], 1 }

</bundles_post_ra>
